<compile_context>
chip_gen: v7x
topology: tpu7x:2x2x1
jax: 0.10.0
libtpu: 0.0.40
codegen_flags: <defaults>
</compile_context>

<pallas_src>
import math
from functools import partial

import jax
import jax.numpy as jnp
import numpy as np
from jax import lax
from jax.experimental import pallas as pl
from jax.experimental.pallas import tpu as pltpu


# ---------------------------------------------------------------------------
# helpers
# ---------------------------------------------------------------------------
def nearest_interpolate_nchw(y, out_h, out_w):
    """PyTorch-semantics nearest interpolation (src = floor(dst * in / out))."""
    _, _, hin, win = y.shape
    rows = (jnp.arange(out_h) * hin // out_h).astype(jnp.int32)
    cols = (jnp.arange(out_w) * win // out_w).astype(jnp.int32)
    return y[:, :, rows[:, None], cols[None, :]]


# ---------------------------------------------------------------------------
# Fused ABF kernel.
#   Stage 1 (once per image, j == 0):
#     x_feat = BN1(W1 @ x)                              (cmid, HW)
#     z      = sigmoid(Wax @ x_feat + Way @ y_up + b)   (2, HW)      [fuse]
#     x_feat = x_feat * z[0] + y_up * z[1]                           [fuse]
#     -> written to xfeat output AND into a zero-padded VMEM scratch.
#   Stage 2 (per cout tile j):
#     y_out[tile] = BN2( sum_{9 taps} W2_tap @ shifted(x_feat) )
#   Nine taps = nine static lane-slices of the padded scratch; row OOB reads
#   hit the zero halo, column wrap-around is masked with hoisted iota masks.
# ---------------------------------------------------------------------------
def _abf_fused_kernel(*refs, H, W, lpad, fuse):
    if fuse:
        (x_ref, y_ref, w1_ref, s1_ref, b1_ref, wax_ref, way_ref, ab_ref,
         w2_ref, s2_ref, b2_ref, xfeat_ref, out_ref, xp_ref) = refs
    else:
        (x_ref, w1_ref, s1_ref, b1_ref,
         w2_ref, s2_ref, b2_ref, xfeat_ref, out_ref, xp_ref) = refs
        y_ref = wax_ref = way_ref = ab_ref = None

    HW = H * W

    # ---- stage 1: run only on the first cout tile of each image ------------
    @pl.when(pl.program_id(1) == 0)
    def _stage1():
        x = x_ref[0]                                               # (cin, HW)
        xf = jnp.dot(w1_ref[...], x, preferred_element_type=jnp.float32)
        xf = xf * s1_ref[...] + b1_ref[...]                        # f32 (cmid, HW)
        if fuse:
            y = y_ref[0]                                           # (cmid, HW)
            logits = (jnp.dot(wax_ref[...], xf.astype(wax_ref.dtype),
                              preferred_element_type=jnp.float32)
                      + jnp.dot(way_ref[...], y,
                                preferred_element_type=jnp.float32)
                      + ab_ref[...])                               # (2, HW)
            z = jax.nn.sigmoid(logits)
            xf = xf * z[0:1, :] + y.astype(jnp.float32) * z[1:2, :]
        xfeat_ref[0] = xf.astype(xfeat_ref.dtype)
        # zero only the two halo pad regions, then drop x_feat into the body.
        zpad = jnp.zeros((xp_ref.shape[0], lpad), xp_ref.dtype)
        xp_ref[:, :lpad] = zpad
        xp_ref[:, lpad + HW:] = zpad
        xp_ref[:, lpad:lpad + HW] = xf.astype(xp_ref.dtype)

    # ---- stage 2: 3x3 conv (stride 1, pad 1, no bias) + folded BN -----------
    # hoist the column-wrap masks out of the tap loop (reused by 6 taps)
    col = lax.broadcasted_iota(jnp.int32, (1, HW), 1) % W
    mask_l = col >= 1          # valid lanes for dx = -1 taps
    mask_r = col < (W - 1)     # valid lanes for dx = +1 taps

    acc = None
    for ky in range(3):
        dy = ky - 1
        for kx in range(3):
            dx = kx - 1
            off = dy * W + dx
            patch = xp_ref[:, lpad + off:lpad + off + HW]          # (cmid, HW)
            if dx == -1:
                patch = jnp.where(mask_l, patch, jnp.zeros_like(patch))
            elif dx == 1:
                patch = jnp.where(mask_r, patch, jnp.zeros_like(patch))
            term = jnp.dot(w2_ref[ky * 3 + kx], patch,
                           preferred_element_type=jnp.float32)     # (ct, HW)
            acc = term if acc is None else acc + term
    out_ref[0] = (acc * s2_ref[...] + b2_ref[...]).astype(out_ref.dtype)


# ---------------------------------------------------------------------------
# Full ABF forward (single pallas_call).
#   act_dtype=bfloat16 halves activation HBM traffic and feeds native-bf16
#   MXU matmuls (f32 accumulation + f32 epilogues in-kernel).
# ---------------------------------------------------------------------------
def abf_forward(params, x_nchw, y_nchw=None, shape=None,
                act_dtype=jnp.float32, out_dtype=jnp.float32, cout_tile=256):
    n, cin, h, w = x_nchw.shape
    hw = h * w
    cmid = params["w1t"].shape[0]
    cout = params["w2t_9"].shape[1]
    fuse = params.get("att_wxT") is not None and y_nchw is not None

    x_flat = x_nchw.reshape(n, cin, hw).astype(act_dtype)
    # weights feeding the MXU are cast once here (bf16 path stays native bf16)
    w1t = params["w1t"].astype(act_dtype)
    w2t_9 = params["w2t_9"].astype(act_dtype)

    # tile output channels only when it divides evenly; the cout axis must be
    # "arbitrary" because stage 1 / scratch-fill is guarded on j == 0.
    ct = cout_tile if (cout > cout_tile and cout % cout_tile == 0) else cout
    n_ct = cout // ct
    lpad = ((w + 1 + 127) // 128) * 128          # lane-aligned halo >= W+1

    kernel = partial(_abf_fused_kernel, H=h, W=w, lpad=lpad, fuse=fuse)

    x_spec = pl.BlockSpec((1, cin, hw), lambda i, j: (i, 0, 0))
    y_spec = pl.BlockSpec((1, cmid, hw), lambda i, j: (i, 0, 0))
    w1_specs = [
        pl.BlockSpec((cmid, cin), lambda i, j: (0, 0)),
        pl.BlockSpec((cmid, 1), lambda i, j: (0, 0)),
        pl.BlockSpec((cmid, 1), lambda i, j: (0, 0)),
    ]
    att_specs = [
        pl.BlockSpec((2, cmid), lambda i, j: (0, 0)),
        pl.BlockSpec((2, cmid), lambda i, j: (0, 0)),
        pl.BlockSpec((2, 1), lambda i, j: (0, 0)),
    ]
    w2_specs = [
        pl.BlockSpec((9, ct, cmid), lambda i, j: (0, j, 0)),
        pl.BlockSpec((ct, 1), lambda i, j: (j, 0)),
        pl.BlockSpec((ct, 1), lambda i, j: (j, 0)),
    ]

    if fuse:
        # TODO(synk): fuse the nearest upsample into the kernel (lane gather).
        y_up = nearest_interpolate_nchw(y_nchw, shape, shape)       # (n,cmid,h,w)
        y_flat = y_up.reshape(n, cmid, hw).astype(act_dtype)
        inputs = (x_flat, y_flat, w1t,
                  params["bn1_scale"], params["bn1_shift"],
                  params["att_wxT"].astype(act_dtype),
                  params["att_wyT"].astype(act_dtype),
                  params["att_b"],
                  w2t_9, params["bn2_scale"], params["bn2_shift"])
        in_specs = [x_spec, y_spec] + w1_specs + att_specs + w2_specs
    else:
        inputs = (x_flat, w1t, params["bn1_scale"], params["bn1_shift"],
                  w2t_9, params["bn2_scale"], params["bn2_shift"])
        in_specs = [x_spec] + w1_specs + w2_specs

    # explicit VMEM budget (scoped defaults: 16/32/32 MiB on v5e/v6e/v7x)
    ea = jnp.dtype(act_dtype).itemsize
    eo = jnp.dtype(out_dtype).itemsize
    vmem_need = (2 * cin * hw * ea                        # x (double buffered)
                 + (2 * cmid * hw * ea if fuse else 0)    # y_up
                 + 2 * cmid * hw * ea                     # x_feat output
                 + 2 * ct * hw * eo                       # y_out tile
                 + cmid * (hw + 2 * lpad) * ea            # padded scratch
                 + 2 * 9 * ct * cmid * ea                 # w2 tile
                 + (2 << 20))                             # small weights + headroom
    vmem_limit = max(32 * 1024 * 1024,
                     min(int(1.5 * vmem_need), 100 * 1024 * 1024))

    x_feat, y_out = pl.pallas_call(
        kernel,
        out_shape=(jax.ShapeDtypeStruct((n, cmid, hw), act_dtype),
                   jax.ShapeDtypeStruct((n, cout, hw), out_dtype)),
        grid_spec=pltpu.PrefetchScalarGridSpec(
            num_scalar_prefetch=0,
            grid=(n, n_ct),
            in_specs=in_specs,
            out_specs=[pl.BlockSpec((1, cmid, hw), lambda i, j: (i, 0, 0)),
                       pl.BlockSpec((1, ct, hw), lambda i, j: (i, j, 0))],
            scratch_shapes=[pltpu.VMEM((cmid, hw + 2 * lpad), act_dtype)],
        ),
        compiler_params=pltpu.CompilerParams(
            dimension_semantics=("parallel", "arbitrary"),
            vmem_limit_bytes=vmem_limit),
    )(*inputs)

    return y_out.reshape(n, cout, h, w), x_feat.reshape(n, cmid, h, w)


# ---------------------------------------------------------------------------
# Pure-JAX reference (lax.conv) for correctness checking
# ---------------------------------------------------------------------------
def abf_reference(params, x, y=None, shape=None):
    cmid = params["w1t"].shape[0]
    cout = params["w2t_9"].shape[1]
    dn = ("NCHW", "OIHW", "NCHW")

    w1 = params["w1t"][:, :, None, None]
    x1 = lax.conv_general_dilated(x, w1, (1, 1), "VALID", dimension_numbers=dn)
    x1 = (x1 * params["bn1_scale"].reshape(1, cmid, 1, 1)
          + params["bn1_shift"].reshape(1, cmid, 1, 1))

    if params.get("att_wxT") is not None and y is not None:
        y_up = nearest_interpolate_nchw(y, shape, shape)
        watt = jnp.concatenate([params["att_wxT"], params["att_wyT"]], axis=1)
        watt = watt[:, :, None, None]
        z_in = jnp.concatenate([x1, y_up], axis=1)
        z = lax.conv_general_dilated(z_in, watt, (1, 1), "VALID",
                                     dimension_numbers=dn)
        z = jax.nn.sigmoid(z + params["att_b"].reshape(1, 2, 1, 1))
        x1 = x1 * z[:, 0:1] + y_up * z[:, 1:2]

    w2 = params["w2t_9"].reshape(3, 3, cout, cmid)
    w2 = jnp.transpose(w2, (2, 3, 0, 1))                  # OIHW
    y2 = lax.conv_general_dilated(x1, w2, (1, 1), ((1, 1), (1, 1)),
                                  dimension_numbers=dn)
    y2 = (y2 * params["bn2_scale"].reshape(1, cout, 1, 1)
          + params["bn2_shift"].reshape(1, cout, 1, 1))
    return y2, x1


# ---------------------------------------------------------------------------
# Deterministic parameter construction (mirrors ABF.__init__ shapes / init)
# ---------------------------------------------------------------------------
def make_params(key, in_channel, mid_channel, out_channel, fuse=True):
    ks = jax.random.split(key, 12)
    eps = 1e-5

    def bn_fold(kg, kb, km, kv, c):
        gamma = 1.0 + 0.1 * jax.random.normal(kg, (c,), jnp.float32)
        beta = 0.1 * jax.random.normal(kb, (c,), jnp.float32)
        mean = 0.1 * jax.random.normal(km, (c,), jnp.float32)
        var = jax.random.uniform(kv, (c,), jnp.float32, 0.5, 1.5)
        scale = gamma / jnp.sqrt(var + eps)
        shift = beta - mean * scale
        return scale.reshape(c, 1), shift.reshape(c, 1)

    # conv1: kaiming_uniform(a=1) -> bound = sqrt(3 / fan_in), fan_in = cin
    b1 = math.sqrt(3.0 / in_channel)
    w1t = jax.random.uniform(ks[0], (mid_channel, in_channel), jnp.float32, -b1, b1)

    # conv2: fan_in = cmid * 9; PyTorch weight layout (cout, cmid, 3, 3)
    b2 = math.sqrt(3.0 / (mid_channel * 9))
    w2 = jax.random.uniform(ks[1], (out_channel, mid_channel, 3, 3),
                            jnp.float32, -b2, b2)
    # per-tap (cout, cmid): w2t_9[ky*3+kx, o, i] = w2[o, i, ky, kx]
    w2t_9 = jnp.transpose(w2, (2, 3, 0, 1)).reshape(9, out_channel, mid_channel)

    bn1_scale, bn1_shift = bn_fold(ks[2], ks[3], ks[4], ks[5], mid_channel)
    bn2_scale, bn2_shift = bn_fold(ks[6], ks[7], ks[8], ks[9], out_channel)

    params = {
        "w1t": w1t, "w2t_9": w2t_9,
        "bn1_scale": bn1_scale, "bn1_shift": bn1_shift,
        "bn2_scale": bn2_scale, "bn2_shift": bn2_shift,
        "att_wxT": None, "att_wyT": None, "att_b": None,
    }
    if fuse:
        ba = 1.0 / math.sqrt(2 * mid_channel)
        watt = jax.random.uniform(ks[10], (2, 2 * mid_channel), jnp.float32, -ba, ba)
        batt = jax.random.uniform(ks[11], (2, 1), jnp.float32, -ba, ba)
        params["att_wxT"] = watt[:, :mid_channel]
        params["att_wyT"] = watt[:, mid_channel:]
        params["att_b"] = batt
    return params


if __name__ == "__main__":
    in_channel, mid_channel, out_channel = 8, 16, 16
    N, H, W = 2, 16, 16
    shape = 16                        # target spatial size for y interpolation

    key = jax.random.PRNGKey(0)
    kx, ky, kp = jax.random.split(key, 3)
    x = jax.random.normal(kx, (N, in_channel, H, W), jnp.float32)
    y = jax.random.normal(ky, (N, mid_channel, 8, 8), jnp.float32)
    params = make_params(kp, in_channel, mid_channel, out_channel, fuse=True)

    # fused (attention) path, fp32
    y_out, x_out = abf_forward(params, x, y, shape)
    y_out = jax.block_until_ready(y_out)
    x_out = jax.block_until_ready(x_out)
    y_ref, x_ref = abf_reference(params, x, y, shape)
    np.testing.assert_allclose(np.asarray(x_out), np.asarray(x_ref), rtol=1e-4, atol=1e-4)
    np.testing.assert_allclose(np.asarray(y_out), np.asarray(y_ref), rtol=1e-4, atol=1e-4)
    assert y_out.shape == (N, out_channel, H, W)
    assert x_out.shape == (N, mid_channel, H, W)

    # non-fuse path, fp32
    params_nf = make_params(kp, in_channel, mid_channel, out_channel, fuse=False)
    y_nf, x_nf = abf_forward(params_nf, x)
    y_nf = jax.block_until_ready(y_nf)
    y_nf_ref, x_nf_ref = abf_reference(params_nf, x)
    np.testing.assert_allclose(np.asarray(x_nf), np.asarray(x_nf_ref), rtol=1e-4, atol=1e-4)
    np.testing.assert_allclose(np.asarray(y_nf), np.asarray(y_nf_ref), rtol=1e-4, atol=1e-4)

    # bf16-activation path (HBM bandwidth / native-bf16 MXU) — loose sanity check
    y_bf, x_bf = abf_forward(params, x, y, shape, act_dtype=jnp.bfloat16)
    y_bf = jax.block_until_ready(y_bf)
    np.testing.assert_allclose(np.asarray(y_bf.astype(jnp.float32)),
                               np.asarray(y_ref), rtol=0.25, atol=0.25)
    np.testing.assert_allclose(np.asarray(x_bf.astype(jnp.float32)),
                               np.asarray(x_ref), rtol=0.25, atol=0.25)

    print("KERNEL_OK")
</pallas_src>

<mosaic_0001>
module attributes {stable_mosaic.version = 11 : i64} {
  func.func @_abf_fused_kernel(%arg0: i32, %arg1: i32, %arg2: memref<1x8x256xf32, #tpu.memory_space<vmem>>, %arg3: memref<1x16x256xf32, #tpu.memory_space<vmem>>, %arg4: memref<16x8xf32, #tpu.memory_space<vmem>>, %arg5: memref<16x1xf32, #tpu.memory_space<vmem>>, %arg6: memref<16x1xf32, #tpu.memory_space<vmem>>, %arg7: memref<2x16xf32, #tpu.memory_space<vmem>>, %arg8: memref<2x16xf32, #tpu.memory_space<vmem>>, %arg9: memref<2x1xf32, #tpu.memory_space<vmem>>, %arg10: memref<9x16x16xf32, #tpu.memory_space<vmem>>, %arg11: memref<16x1xf32, #tpu.memory_space<vmem>>, %arg12: memref<16x1xf32, #tpu.memory_space<vmem>>, %arg13: memref<1x16x256xf32, #tpu.memory_space<vmem>>, %arg14: memref<1x16x256xf32, #tpu.memory_space<vmem>>, %arg15: memref<16x512xf32, #tpu.memory_space<vmem>>) attributes {dimension_semantics = [#tpu.dimension_semantics<parallel>, #tpu.dimension_semantics<arbitrary>], iteration_bounds = array<i64: 2, 1>, scalar_prefetch = 0 : i64, scratch_operands = 1 : i64, tpu.core_type = #tpu.core_type<tc>, window_params = [{transform_indices = @transform_0, window_bounds = array<i64: 1, 8, 256>}, {transform_indices = @transform_1, window_bounds = array<i64: 1, 16, 256>}, {pipeline_mode = #tpu.pipeline_mode<synchronous>, transform_indices = @transform_2, window_bounds = array<i64: 16, 8>}, {pipeline_mode = #tpu.pipeline_mode<synchronous>, transform_indices = @transform_3, window_bounds = array<i64: 16, 1>}, {pipeline_mode = #tpu.pipeline_mode<synchronous>, transform_indices = @transform_4, window_bounds = array<i64: 16, 1>}, {pipeline_mode = #tpu.pipeline_mode<synchronous>, transform_indices = @transform_5, window_bounds = array<i64: 2, 16>}, {pipeline_mode = #tpu.pipeline_mode<synchronous>, transform_indices = @transform_6, window_bounds = array<i64: 2, 16>}, {pipeline_mode = #tpu.pipeline_mode<synchronous>, transform_indices = @transform_7, window_bounds = array<i64: 2, 1>}, {transform_indices = @transform_8, window_bounds = array<i64: 9, 16, 16>}, {transform_indices = @transform_9, window_bounds = array<i64: 16, 1>}, {transform_indices = @transform_10, window_bounds = array<i64: 16, 1>}, {transform_indices = @transform_11, window_bounds = array<i64: 1, 16, 256>}, {transform_indices = @transform_12, window_bounds = array<i64: 1, 16, 256>}]} {
    %c0_i32 = arith.constant 0 : i32
    %0 = arith.cmpi eq, %arg1, %c0_i32 : i32
    %1 = arith.extui %0 : i1 to i32
    %c0_i32_0 = arith.constant 0 : i32
    %2 = arith.cmpi ne, %1, %c0_i32_0 : i32
    scf.if %2 {
      %c0_54 = arith.constant 0 : index
      %c0_55 = arith.constant 0 : index
      %c0_56 = arith.constant 0 : index
      %101 = vector.load %arg2[%c0_54, %c0_55, %c0_56] : memref<1x8x256xf32, #tpu.memory_space<vmem>>, vector<1x8x256xf32>
      %102 = vector.shape_cast %101 : vector<1x8x256xf32> to vector<8x256xf32>
      %c0_57 = arith.constant 0 : index
      %c0_58 = arith.constant 0 : index
      %103 = vector.load %arg4[%c0_57, %c0_58] : memref<16x8xf32, #tpu.memory_space<vmem>>, vector<16x8xf32>
      %cst_59 = arith.constant dense<0.000000e+00> : vector<16x256xf32>
      %104 = tpu.matmul %103, %102, %cst_59 {dimension_numbers = #tpu.dot_dimension_numbers<[1], [0], [0], [1], [0, 0, 1, 1], [], []>} : vector<16x8xf32>, vector<8x256xf32>, vector<16x256xf32> -> vector<16x256xf32>
      %c0_60 = arith.constant 0 : index
      %c0_61 = arith.constant 0 : index
      %105 = vector.load %arg5[%c0_60, %c0_61] : memref<16x1xf32, #tpu.memory_space<vmem>>, vector<16x1xf32>
      %106 = vector.broadcast %105 : vector<16x1xf32> to vector<16x256xf32>
      %107 = arith.mulf %104, %106 : vector<16x256xf32>
      %c0_62 = arith.constant 0 : index
      %c0_63 = arith.constant 0 : index
      %108 = vector.load %arg6[%c0_62, %c0_63] : memref<16x1xf32, #tpu.memory_space<vmem>>, vector<16x1xf32>
      %109 = vector.broadcast %108 : vector<16x1xf32> to vector<16x256xf32>
      %110 = arith.addf %107, %109 : vector<16x256xf32>
      %c0_64 = arith.constant 0 : index
      %c0_65 = arith.constant 0 : index
      %c0_66 = arith.constant 0 : index
      %111 = vector.load %arg3[%c0_64, %c0_65, %c0_66] : memref<1x16x256xf32, #tpu.memory_space<vmem>>, vector<1x16x256xf32>
      %112 = vector.shape_cast %111 : vector<1x16x256xf32> to vector<16x256xf32>
      %c0_67 = arith.constant 0 : index
      %c0_68 = arith.constant 0 : index
      %113 = vector.load %arg7[%c0_67, %c0_68] : memref<2x16xf32, #tpu.memory_space<vmem>>, vector<2x16xf32>
      %cst_69 = arith.constant dense<0.000000e+00> : vector<2x256xf32>
      %114 = tpu.matmul %113, %110, %cst_69 {dimension_numbers = #tpu.dot_dimension_numbers<[1], [0], [0], [1], [0, 0, 1, 1], [], []>} : vector<2x16xf32>, vector<16x256xf32>, vector<2x256xf32> -> vector<2x256xf32>
      %c0_70 = arith.constant 0 : index
      %c0_71 = arith.constant 0 : index
      %115 = vector.load %arg8[%c0_70, %c0_71] : memref<2x16xf32, #tpu.memory_space<vmem>>, vector<2x16xf32>
      %cst_72 = arith.constant dense<0.000000e+00> : vector<2x256xf32>
      %116 = tpu.matmul %115, %112, %cst_72 {dimension_numbers = #tpu.dot_dimension_numbers<[1], [0], [0], [1], [0, 0, 1, 1], [], []>} : vector<2x16xf32>, vector<16x256xf32>, vector<2x256xf32> -> vector<2x256xf32>
      %117 = arith.addf %114, %116 : vector<2x256xf32>
      %c0_73 = arith.constant 0 : index
      %c0_74 = arith.constant 0 : index
      %118 = vector.load %arg9[%c0_73, %c0_74] : memref<2x1xf32, #tpu.memory_space<vmem>>, vector<2x1xf32>
      %119 = vector.broadcast %118 : vector<2x1xf32> to vector<2x256xf32>
      %120 = arith.addf %117, %119 : vector<2x256xf32>
      %121 = arith.negf %120 : vector<2x256xf32>
      %122 = math.exp %121 : vector<2x256xf32>
      %cst_75 = arith.constant 1.000000e+00 : f32
      %123 = vector.broadcast %cst_75 : f32 to vector<2x256xf32>
      %124 = arith.addf %123, %122 : vector<2x256xf32>
      %125 = arith.divf %123, %124 : vector<2x256xf32>
      %126 = vector.extract_strided_slice %125 {offsets = [0, 0], sizes = [1, 256], strides = [1, 1]} : vector<2x256xf32> to vector<1x256xf32>
      %127 = vector.broadcast %126 : vector<1x256xf32> to vector<16x256xf32>
      %128 = arith.mulf %110, %127 : vector<16x256xf32>
      %129 = vector.extract_strided_slice %125 {offsets = [1, 0], sizes = [1, 256], strides = [1, 1]} : vector<2x256xf32> to vector<1x256xf32>
      %130 = vector.broadcast %129 : vector<1x256xf32> to vector<16x256xf32>
      %131 = arith.mulf %112, %130 : vector<16x256xf32>
      %132 = arith.addf %128, %131 : vector<16x256xf32>
      %c0_76 = arith.constant 0 : index
      %c0_77 = arith.constant 0 : index
      %c0_78 = arith.constant 0 : index
      %133 = vector.load %arg13[%c0_76, %c0_77, %c0_78] : memref<1x16x256xf32, #tpu.memory_space<vmem>>, vector<1x16x256xf32>
      %134 = vector.shape_cast %133 : vector<1x16x256xf32> to vector<16x256xf32>
      %135 = vector.shape_cast %132 : vector<16x256xf32> to vector<1x16x256xf32>
      tpu.vector_store %arg13[%c0_76, %c0_77, %c0_78], %135 {strides = array<i32>} : memref<1x16x256xf32, #tpu.memory_space<vmem>>, vector<1x16x256xf32>,
      %cst_79 = arith.constant 0.000000e+00 : f32
      %136 = vector.broadcast %cst_79 : f32 to vector<16x128xf32>
      %c0_80 = arith.constant 0 : index
      %c0_81 = arith.constant 0 : index
      %137 = vector.load %arg15[%c0_80, %c0_81] : memref<16x512xf32, #tpu.memory_space<vmem>>, vector<16x128xf32>
      tpu.vector_store %arg15[%c0_80, %c0_81], %136 {strides = array<i32>} : memref<16x512xf32, #tpu.memory_space<vmem>>, vector<16x128xf32>,
      %c0_82 = arith.constant 0 : index
      %c384 = arith.constant 384 : index
      %138 = vector.load %arg15[%c0_82, %c384] : memref<16x512xf32, #tpu.memory_space<vmem>>, vector<16x128xf32>
      tpu.vector_store %arg15[%c0_82, %c384], %136 {strides = array<i32>} : memref<16x512xf32, #tpu.memory_space<vmem>>, vector<16x128xf32>,
      %c0_83 = arith.constant 0 : index
      %c128_84 = arith.constant 128 : index
      %139 = vector.load %arg15[%c0_83, %c128_84] : memref<16x512xf32, #tpu.memory_space<vmem>>, vector<16x256xf32>
      tpu.vector_store %arg15[%c0_83, %c128_84], %132 {strides = array<i32>} : memref<16x512xf32, #tpu.memory_space<vmem>>, vector<16x256xf32>,
    } else {
    }
    %3 = tpu.iota {dimensions = array<i32: 1>} : vector<1x256xi32>
    %c16_i32 = arith.constant 16 : i32
    %c0_i32_1 = arith.constant 0 : i32
    %4 = arith.cmpi eq, %c16_i32, %c0_i32_1 : i32
    %c1_i32 = arith.constant 1 : i32
    %5 = arith.select %4, %c1_i32, %c16_i32 : i32
    %6 = vector.broadcast %5 : i32 to vector<1x256xi32>
    %7 = arith.remsi %3, %6 : vector<1x256xi32>
    %c0_i32_2 = arith.constant 0 : i32
    %8 = vector.broadcast %c0_i32_2 : i32 to vector<1x256xi32>
    %9 = arith.cmpi ne, %7, %8 : vector<1x256xi32>
    %c0_i32_3 = arith.constant 0 : i32
    %10 = vector.broadcast %c0_i32_3 : i32 to vector<1x256xi32>
    %11 = arith.cmpi slt, %7, %10 : vector<1x256xi32>
    %c0_i32_4 = arith.constant 0 : i32
    %12 = arith.cmpi slt, %5, %c0_i32_4 : i32
    %13 = vector.broadcast %12 : i1 to vector<1x256xi1>
    %14 = vector.broadcast %13 : vector<1x256xi1> to vector<1x256xi1>
    %15 = arith.xori %11, %14 : vector<1x256xi1>
    %16 = arith.andi %15, %9 : vector<1x256xi1>
    %17 = vector.broadcast %5 : i32 to vector<1x256xi32>
    %18 = arith.addi %7, %17 : vector<1x256xi32>
    %19 = arith.select %16, %18, %7 : vector<1x256xi1>, vector<1x256xi32>
    %c1_i32_5 = arith.constant 1 : i32
    %20 = vector.broadcast %c1_i32_5 : i32 to vector<1x256xi32>
    %21 = arith.cmpi sge, %19, %20 : vector<1x256xi32>
    %c15_i32 = arith.constant 15 : i32
    %22 = vector.broadcast %c15_i32 : i32 to vector<1x256xi32>
    %23 = arith.cmpi slt, %19, %22 : vector<1x256xi32>
    %c0 = arith.constant 0 : index
    %c111 = arith.constant 111 : index
    %24 = vector.load %arg15[%c0, %c111] : memref<16x512xf32, #tpu.memory_space<vmem>>, vector<16x256xf32>
    %cst = arith.constant 0.000000e+00 : f32
    %25 = vector.broadcast %cst : f32 to vector<16x256xf32>
    %26 = vector.shape_cast %21 : vector<1x256xi1> to vector<1x256xi1>
    %27 = vector.broadcast %26 : vector<1x256xi1> to vector<16x256xi1>
    %28 = arith.select %27, %24, %25 : vector<16x256xi1>, vector<16x256xf32>
    %c0_6 = arith.constant 0 : index
    %c0_7 = arith.constant 0 : index
    %c0_8 = arith.constant 0 : index
    %29 = vector.load %arg10[%c0_6, %c0_7, %c0_8] : memref<9x16x16xf32, #tpu.memory_space<vmem>>, vector<1x16x16xf32>
    %30 = vector.shape_cast %29 : vector<1x16x16xf32> to vector<16x16xf32>
    %cst_9 = arith.constant dense<0.000000e+00> : vector<16x256xf32>
    %31 = tpu.matmul %30, %28, %cst_9 {dimension_numbers = #tpu.dot_dimension_numbers<[1], [0], [0], [1], [0, 0, 1, 1], [], []>} : vector<16x16xf32>, vector<16x256xf32>, vector<16x256xf32> -> vector<16x256xf32>
    %c0_10 = arith.constant 0 : index
    %c112 = arith.constant 112 : index
    %32 = vector.load %arg15[%c0_10, %c112] : memref<16x512xf32, #tpu.memory_space<vmem>>, vector<16x256xf32>
    %c1 = arith.constant 1 : index
    %c0_11 = arith.constant 0 : index
    %c0_12 = arith.constant 0 : index
    %33 = vector.load %arg10[%c1, %c0_11, %c0_12] : memref<9x16x16xf32, #tpu.memory_space<vmem>>, vector<1x16x16xf32>
    %34 = vector.shape_cast %33 : vector<1x16x16xf32> to vector<16x16xf32>
    %cst_13 = arith.constant dense<0.000000e+00> : vector<16x256xf32>
    %35 = tpu.matmul %34, %32, %cst_13 {dimension_numbers = #tpu.dot_dimension_numbers<[1], [0], [0], [1], [0, 0, 1, 1], [], []>} : vector<16x16xf32>, vector<16x256xf32>, vector<16x256xf32> -> vector<16x256xf32>
    %36 = arith.addf %31, %35 : vector<16x256xf32>
    %c0_14 = arith.constant 0 : index
    %c113 = arith.constant 113 : index
    %37 = vector.load %arg15[%c0_14, %c113] : memref<16x512xf32, #tpu.memory_space<vmem>>, vector<16x256xf32>
    %cst_15 = arith.constant 0.000000e+00 : f32
    %38 = vector.broadcast %cst_15 : f32 to vector<16x256xf32>
    %39 = vector.shape_cast %23 : vector<1x256xi1> to vector<1x256xi1>
    %40 = vector.broadcast %39 : vector<1x256xi1> to vector<16x256xi1>
    %41 = arith.select %40, %37, %38 : vector<16x256xi1>, vector<16x256xf32>
    %c2 = arith.constant 2 : index
    %c0_16 = arith.constant 0 : index
    %c0_17 = arith.constant 0 : index
    %42 = vector.load %arg10[%c2, %c0_16, %c0_17] : memref<9x16x16xf32, #tpu.memory_space<vmem>>, vector<1x16x16xf32>
    %43 = vector.shape_cast %42 : vector<1x16x16xf32> to vector<16x16xf32>
    %cst_18 = arith.constant dense<0.000000e+00> : vector<16x256xf32>
    %44 = tpu.matmul %43, %41, %cst_18 {dimension_numbers = #tpu.dot_dimension_numbers<[1], [0], [0], [1], [0, 0, 1, 1], [], []>} : vector<16x16xf32>, vector<16x256xf32>, vector<16x256xf32> -> vector<16x256xf32>
    %45 = arith.addf %36, %44 : vector<16x256xf32>
    %c0_19 = arith.constant 0 : index
    %c127 = arith.constant 127 : index
    %46 = vector.load %arg15[%c0_19, %c127] : memref<16x512xf32, #tpu.memory_space<vmem>>, vector<16x256xf32>
    %cst_20 = arith.constant 0.000000e+00 : f32
    %47 = vector.broadcast %cst_20 : f32 to vector<16x256xf32>
    %48 = vector.shape_cast %21 : vector<1x256xi1> to vector<1x256xi1>
    %49 = vector.broadcast %48 : vector<1x256xi1> to vector<16x256xi1>
    %50 = arith.select %49, %46, %47 : vector<16x256xi1>, vector<16x256xf32>
    %c3 = arith.constant 3 : index
    %c0_21 = arith.constant 0 : index
    %c0_22 = arith.constant 0 : index
    %51 = vector.load %arg10[%c3, %c0_21, %c0_22] : memref<9x16x16xf32, #tpu.memory_space<vmem>>, vector<1x16x16xf32>
    %52 = vector.shape_cast %51 : vector<1x16x16xf32> to vector<16x16xf32>
    %cst_23 = arith.constant dense<0.000000e+00> : vector<16x256xf32>
    %53 = tpu.matmul %52, %50, %cst_23 {dimension_numbers = #tpu.dot_dimension_numbers<[1], [0], [0], [1], [0, 0, 1, 1], [], []>} : vector<16x16xf32>, vector<16x256xf32>, vector<16x256xf32> -> vector<16x256xf32>
    %54 = arith.addf %45, %53 : vector<16x256xf32>
    %c0_24 = arith.constant 0 : index
    %c128 = arith.constant 128 : index
    %55 = vector.load %arg15[%c0_24, %c128] : memref<16x512xf32, #tpu.memory_space<vmem>>, vector<16x256xf32>
    %c4 = arith.constant 4 : index
    %c0_25 = arith.constant 0 : index
    %c0_26 = arith.constant 0 : index
    %56 = vector.load %arg10[%c4, %c0_25, %c0_26] : memref<9x16x16xf32, #tpu.memory_space<vmem>>, vector<1x16x16xf32>
    %57 = vector.shape_cast %56 : vector<1x16x16xf32> to vector<16x16xf32>
    %cst_27 = arith.constant dense<0.000000e+00> : vector<16x256xf32>
    %58 = tpu.matmul %57, %55, %cst_27 {dimension_numbers = #tpu.dot_dimension_numbers<[1], [0], [0], [1], [0, 0, 1, 1], [], []>} : vector<16x16xf32>, vector<16x256xf32>, vector<16x256xf32> -> vector<16x256xf32>
    %59 = arith.addf %54, %58 : vector<16x256xf32>
    %c0_28 = arith.constant 0 : index
    %c129 = arith.constant 129 : index
    %60 = vector.load %arg15[%c0_28, %c129] : memref<16x512xf32, #tpu.memory_space<vmem>>, vector<16x256xf32>
    %cst_29 = arith.constant 0.000000e+00 : f32
    %61 = vector.broadcast %cst_29 : f32 to vector<16x256xf32>
    %62 = vector.shape_cast %23 : vector<1x256xi1> to vector<1x256xi1>
    %63 = vector.broadcast %62 : vector<1x256xi1> to vector<16x256xi1>
    %64 = arith.select %63, %60, %61 : vector<16x256xi1>, vector<16x256xf32>
    %c5 = arith.constant 5 : index
    %c0_30 = arith.constant 0 : index
    %c0_31 = arith.constant 0 : index
    %65 = vector.load %arg10[%c5, %c0_30, %c0_31] : memref<9x16x16xf32, #tpu.memory_space<vmem>>, vector<1x16x16xf32>
    %66 = vector.shape_cast %65 : vector<1x16x16xf32> to vector<16x16xf32>
    %cst_32 = arith.constant dense<0.000000e+00> : vector<16x256xf32>
    %67 = tpu.matmul %66, %64, %cst_32 {dimension_numbers = #tpu.dot_dimension_numbers<[1], [0], [0], [1], [0, 0, 1, 1], [], []>} : vector<16x16xf32>, vector<16x256xf32>, vector<16x256xf32> -> vector<16x256xf32>
    %68 = arith.addf %59, %67 : vector<16x256xf32>
    %c0_33 = arith.constant 0 : index
    %c143 = arith.constant 143 : index
    %69 = vector.load %arg15[%c0_33, %c143] : memref<16x512xf32, #tpu.memory_space<vmem>>, vector<16x256xf32>
    %cst_34 = arith.constant 0.000000e+00 : f32
    %70 = vector.broadcast %cst_34 : f32 to vector<16x256xf32>
    %71 = vector.shape_cast %21 : vector<1x256xi1> to vector<1x256xi1>
    %72 = vector.broadcast %71 : vector<1x256xi1> to vector<16x256xi1>
    %73 = arith.select %72, %69, %70 : vector<16x256xi1>, vector<16x256xf32>
    %c6 = arith.constant 6 : index
    %c0_35 = arith.constant 0 : index
    %c0_36 = arith.constant 0 : index
    %74 = vector.load %arg10[%c6, %c0_35, %c0_36] : memref<9x16x16xf32, #tpu.memory_space<vmem>>, vector<1x16x16xf32>
    %75 = vector.shape_cast %74 : vector<1x16x16xf32> to vector<16x16xf32>
    %cst_37 = arith.constant dense<0.000000e+00> : vector<16x256xf32>
    %76 = tpu.matmul %75, %73, %cst_37 {dimension_numbers = #tpu.dot_dimension_numbers<[1], [0], [0], [1], [0, 0, 1, 1], [], []>} : vector<16x16xf32>, vector<16x256xf32>, vector<16x256xf32> -> vector<16x256xf32>
    %77 = arith.addf %68, %76 : vector<16x256xf32>
    %c0_38 = arith.constant 0 : index
    %c144 = arith.constant 144 : index
    %78 = vector.load %arg15[%c0_38, %c144] : memref<16x512xf32, #tpu.memory_space<vmem>>, vector<16x256xf32>
    %c7 = arith.constant 7 : index
    %c0_39 = arith.constant 0 : index
    %c0_40 = arith.constant 0 : index
    %79 = vector.load %arg10[%c7, %c0_39, %c0_40] : memref<9x16x16xf32, #tpu.memory_space<vmem>>, vector<1x16x16xf32>
    %80 = vector.shape_cast %79 : vector<1x16x16xf32> to vector<16x16xf32>
    %cst_41 = arith.constant dense<0.000000e+00> : vector<16x256xf32>
    %81 = tpu.matmul %80, %78, %cst_41 {dimension_numbers = #tpu.dot_dimension_numbers<[1], [0], [0], [1], [0, 0, 1, 1], [], []>} : vector<16x16xf32>, vector<16x256xf32>, vector<16x256xf32> -> vector<16x256xf32>
    %82 = arith.addf %77, %81 : vector<16x256xf32>
    %c0_42 = arith.constant 0 : index
    %c145 = arith.constant 145 : index
    %83 = vector.load %arg15[%c0_42, %c145] : memref<16x512xf32, #tpu.memory_space<vmem>>, vector<16x256xf32>
    %cst_43 = arith.constant 0.000000e+00 : f32
    %84 = vector.broadcast %cst_43 : f32 to vector<16x256xf32>
    %85 = vector.shape_cast %23 : vector<1x256xi1> to vector<1x256xi1>
    %86 = vector.broadcast %85 : vector<1x256xi1> to vector<16x256xi1>
    %87 = arith.select %86, %83, %84 : vector<16x256xi1>, vector<16x256xf32>
    %c8 = arith.constant 8 : index
    %c0_44 = arith.constant 0 : index
    %c0_45 = arith.constant 0 : index
    %88 = vector.load %arg10[%c8, %c0_44, %c0_45] : memref<9x16x16xf32, #tpu.memory_space<vmem>>, vector<1x16x16xf32>
    %89 = vector.shape_cast %88 : vector<1x16x16xf32> to vector<16x16xf32>
    %cst_46 = arith.constant dense<0.000000e+00> : vector<16x256xf32>
    %90 = tpu.matmul %89, %87, %cst_46 {dimension_numbers = #tpu.dot_dimension_numbers<[1], [0], [0], [1], [0, 0, 1, 1], [], []>} : vector<16x16xf32>, vector<16x256xf32>, vector<16x256xf32> -> vector<16x256xf32>
    %91 = arith.addf %82, %90 : vector<16x256xf32>
    %c0_47 = arith.constant 0 : index
    %c0_48 = arith.constant 0 : index
    %92 = vector.load %arg11[%c0_47, %c0_48] : memref<16x1xf32, #tpu.memory_space<vmem>>, vector<16x1xf32>
    %93 = vector.broadcast %92 : vector<16x1xf32> to vector<16x256xf32>
    %94 = arith.mulf %91, %93 : vector<16x256xf32>
    %c0_49 = arith.constant 0 : index
    %c0_50 = arith.constant 0 : index
    %95 = vector.load %arg12[%c0_49, %c0_50] : memref<16x1xf32, #tpu.memory_space<vmem>>, vector<16x1xf32>
    %96 = vector.broadcast %95 : vector<16x1xf32> to vector<16x256xf32>
    %97 = arith.addf %94, %96 : vector<16x256xf32>
    %c0_51 = arith.constant 0 : index
    %c0_52 = arith.constant 0 : index
    %c0_53 = arith.constant 0 : index
    %98 = vector.load %arg14[%c0_51, %c0_52, %c0_53] : memref<1x16x256xf32, #tpu.memory_space<vmem>>, vector<1x16x256xf32>
    %99 = vector.shape_cast %98 : vector<1x16x256xf32> to vector<16x256xf32>
    %100 = vector.shape_cast %97 : vector<16x256xf32> to vector<1x16x256xf32>
    tpu.vector_store %arg14[%c0_51, %c0_52, %c0_53], %100 {strides = array<i32>} : memref<1x16x256xf32, #tpu.memory_space<vmem>>, vector<1x16x256xf32>,
    return
  }
  func.func @transform_0(%arg0: i32, %arg1: i32) -> (i32, i32, i32) {
    %c0_i32 = arith.constant 0 : i32
    %c0_i32_0 = arith.constant 0 : i32
    %c0_i32_1 = arith.constant 0 : i32
    return %arg0, %c0_i32, %c0_i32_0 : i32, i32, i32
  }
  func.func @transform_1(%arg0: i32, %arg1: i32) -> (i32, i32, i32) {
    %c0_i32 = arith.constant 0 : i32
    %c0_i32_0 = arith.constant 0 : i32
    %c0_i32_1 = arith.constant 0 : i32
    return %arg0, %c0_i32, %c0_i32_0 : i32, i32, i32
  }
  func.func @transform_2(%arg0: i32, %arg1: i32) -> (i32, i32) {
    %c0_i32 = arith.constant 0 : i32
    %c0_i32_0 = arith.constant 0 : i32
    %c0_i32_1 = arith.constant 0 : i32
    return %c0_i32, %c0_i32_0 : i32, i32
  }
  func.func @transform_3(%arg0: i32, %arg1: i32) -> (i32, i32) {
    %c0_i32 = arith.constant 0 : i32
    %c0_i32_0 = arith.constant 0 : i32
    %c0_i32_1 = arith.constant 0 : i32
    return %c0_i32, %c0_i32_0 : i32, i32
  }
  func.func @transform_4(%arg0: i32, %arg1: i32) -> (i32, i32) {
    %c0_i32 = arith.constant 0 : i32
    %c0_i32_0 = arith.constant 0 : i32
    %c0_i32_1 = arith.constant 0 : i32
    return %c0_i32, %c0_i32_0 : i32, i32
  }
  func.func @transform_5(%arg0: i32, %arg1: i32) -> (i32, i32) {
    %c0_i32 = arith.constant 0 : i32
    %c0_i32_0 = arith.constant 0 : i32
    %c0_i32_1 = arith.constant 0 : i32
    return %c0_i32, %c0_i32_0 : i32, i32
  }
  func.func @transform_6(%arg0: i32, %arg1: i32) -> (i32, i32) {
    %c0_i32 = arith.constant 0 : i32
    %c0_i32_0 = arith.constant 0 : i32
    %c0_i32_1 = arith.constant 0 : i32
    return %c0_i32, %c0_i32_0 : i32, i32
  }
  func.func @transform_7(%arg0: i32, %arg1: i32) -> (i32, i32) {
    %c0_i32 = arith.constant 0 : i32
    %c0_i32_0 = arith.constant 0 : i32
    %c0_i32_1 = arith.constant 0 : i32
    return %c0_i32, %c0_i32_0 : i32, i32
  }
  func.func @transform_8(%arg0: i32, %arg1: i32) -> (i32, i32, i32) {
    %c0_i32 = arith.constant 0 : i32
    %c0_i32_0 = arith.constant 0 : i32
    %c0_i32_1 = arith.constant 0 : i32
    return %c0_i32, %arg1, %c0_i32_0 : i32, i32, i32
  }
  func.func @transform_9(%arg0: i32, %arg1: i32) -> (i32, i32) {
    %c0_i32 = arith.constant 0 : i32
    %c0_i32_0 = arith.constant 0 : i32
    return %arg1, %c0_i32 : i32, i32
  }
  func.func @transform_10(%arg0: i32, %arg1: i32) -> (i32, i32) {
    %c0_i32 = arith.constant 0 : i32
    %c0_i32_0 = arith.constant 0 : i32
    return %arg1, %c0_i32 : i32, i32
  }
  func.func @transform_11(%arg0: i32, %arg1: i32) -> (i32, i32, i32) {
    %c0_i32 = arith.constant 0 : i32
    %c0_i32_0 = arith.constant 0 : i32
    %c0_i32_1 = arith.constant 0 : i32
    return %arg0, %c0_i32, %c0_i32_0 : i32, i32, i32
  }
  func.func @transform_12(%arg0: i32, %arg1: i32) -> (i32, i32, i32) {
    %c0_i32 = arith.constant 0 : i32
    %c0_i32_0 = arith.constant 0 : i32
    return %arg0, %arg1, %c0_i32 : i32, i32, i32
  }
}

</mosaic_0001>

<bundles_post_ra>
// kernel: tpu_custom_call.1
= control target key start
LH: loop header
LB: loop body
LE: loop exit
PB: predicated region body
PF: predicated region fallthrough
CT: control target
= control target key end

     0   :  { %s3227_s0 = inlined_call_operand.vmem [shape: f32[2,8,256], index: 0, kind: input, shape index: {}]   ;;  %s3228_s1 = inlined_call_operand.vmem [shape: f32[2,16,256], index: 1, kind: input, shape index: {}]   ;;  %s3229_s2 = inlined_call_operand.vmem [shape: f32[16,8], index: 2, kind: input, shape index: {}]   ;;  %s3230_s3 = inlined_call_operand.vmem [shape: f32[16,1], index: 3, kind: input, shape index: {}]   ;;  %s3231_s4 = inlined_call_operand.vmem [shape: f32[16,1], index: 4, kind: input, shape index: {}]   ;;  %s3232_s5 = inlined_call_operand.vmem [shape: f32[2,16], index: 5, kind: input, shape index: {}]   ;;  %s3233_s6 = inlined_call_operand.vmem [shape: f32[2,16], index: 6, kind: input, shape index: {}]   ;;  %s3234_s7 = inlined_call_operand.vmem [shape: f32[2,1], index: 7, kind: input, shape index: {}]   ;;  %s3235_s8 = inlined_call_operand.hbm [shape: f32[9,16,16], index: 8, kind: input, shape index: {}]   ;;  %s3236_s9 = inlined_call_operand.vmem [shape: f32[16,1], index: 9, kind: input, shape index: {}]   ;;  %s3237_s10 = inlined_call_operand.vmem [shape: f32[16,1], index: 10, kind: input, shape index: {}]   ;;  %s3238_s11 = inlined_call_operand.hbm [shape: f32[2,16,256], index: 11, kind: output, shape index: {0}]   ;;  %s3239_s12 = inlined_call_operand.hbm [shape: f32[2,16,256], index: 12, kind: output, shape index: {1}]  }
   0x1   :  { %3252 = sst [smem:[#allocation16_spill]] %s3227_s0 }
   0x2   :  { %18 = vsyncpa [#allocation4], 0 }
   0x3   :  { %19 = vsyncpa [#allocation5], 0 }
   0x4   :  { %21 = vsyncpa [#allocation5 + $0x1], 0 }
   0x5   :  { %22 = vsyncpa [#allocation8], 0 }
   0x6   :  { %24 = vsyncpa [#allocation8 + $0x1], 0  ;;  %s2762_s21 = smov 0   ;;  %s2764_s22 = smov 0  }
   0x7   :  { %s2766_s23 = smov 0   ;;  %s2768_s24 = smov 0  }
   0x8   :  { %s2770_s25 = smov 0   ;;  %s2772_s26 = smov 0  }
   0x9 LB: > { %3253 = sst [smem:[#allocation12_spill]] %s2667_s23  ;;  %s2156_s27 = sadd.s32 4294967295, %s2679_s26   ;;  %s2679_s26 = sphi %s2772_s26, %s30_s26   ;;  %s2675_s25 = sphi %s2770_s25, %s3290_s25   ;;  %s2671_s24 = sphi %s2768_s24, %s3289_s24   ;;  %s2667_s23 = sphi %s2766_s23, %s3288_s23   ;;  %s2663_s22 = sphi %s2764_s22, %s3292_s22   ;;  %s2659_s21 = sphi %s2762_s21, %s3291_s21  }
   0xa   : > { %3254 = sst [smem:[#allocation13_spill]] %s2675_s25  ;;  %s2157_s28 = sadd.s32 4294967294, %s2679_s26  }
   0xb   : > { %s42_s29 = sadd.s32 1, %s2675_s25  ;;  %s305_s30 = sadd.s32 1, %s2667_s23 }
   0xc   : > { %p44_p0 = scmp.ge.s32.totalorder %s42_s29, 2  ;;  %p315_p1 = scmp.ne.s32.totalorder %s2667_s23, %s2663_s22 }
   0xd   : > { %p316_p2 = scmp.eq.s32.totalorder %s2156_s27, 1  ;;  %p321_p3 = scmp.ne.s32.totalorder %s2663_s22, %s2659_s21 }
   0xe   : > { %s3294_s29 = smov (%p44_p0, %s42_s29), 0  ;;  %p322_p5 = scmp.eq.s32.totalorder %s2157_s28, 1 }
   0xf   : > { %3255 = sst [smem:[#allocation14_spill]] %s3294_s29  ;;  %p2802_p4 = por %p316_p2, %p315_p1 }
  0x10   : > { %s302_s14 = ssub.s32 %s2675_s25, %s3294_s29  ;;  %p2158_p6 = scmp.ge.s32.totalorder %s2679_s26, 1 }
  0x11   : > { %s3256_s13 = scalar_select %p2802_p4, 1, 0 }
  0x12   : > { %p303_p7 = scmp.eq.s32.totalorder %s302_s14, 0  ;;  %p2809_p8 = por %p322_p5, %p321_p3 }
  0x13   : > { %p357_p9 = scmp.lt.s32.totalorder %s2679_s26, 3  ;;  %p2821_p11 = scmp.eq.s32.totalorder %s2156_s27, 0 }
  0x14   : > { %s3257_s15 = scalar_select %p2809_p8, 1, 0 }
  0x15   : > { %s2815_s16 = scalar_select %p303_p7, %s2667_s23, %s305_s30  }
  0x16   : > { %p2817_p10 = pnand %p2158_p6, %p357_p9  ;;  %s2681_s19 = smov [#allocation3]  }
  0x17   : > { %3258 = sst [smem:[#allocation15_spill]] %s2815_s16  ;;  %s390_s20 = sshll.u32 %s2681_s19, 4  ;;  %s391_s20 = int_to_ptr.vmem [resolvable:$true] %s390_s20 }
  0x18   : > { %s3259_s17 = scalar_select %p2817_p10, 1, 0 }
  0x19   : > { %s3260_s18 = scalar_select %p2821_p11, 1, 0 }
  0x1a   : > { %p2331_p12 = pneg %p2817_p10  ;;  %s2537_s29 = scalar_lea.hbm %s3235_s8, 2304 }
  0x1b   : > { %p2538_p0 = scmp.ne.s32.totalorder %s3235_s8, %s2537_s29  ;;  %p2544_p5 = scmp.lt.u32.totalorder %s2537_s29, %s3235_s8 }
  0x1c   : > { %p2829_p13 = pnand %p2821_p11, %p2331_p12 }
  0x1e   : > { %p2539_p1 = pneg %p2829_p13 }
  0x20   : > { %p2540_p2 = pnand %p2539_p1, %p2538_p0 }
  0x22   : > { %p2541_p3 = pneg %p2540_p2 }
  0x24   : > { %p2546_p6 = pnand %p2544_p5, %p2541_p3 }
  0x26   : > { %2549 = shalt.err (!%p2546_p6)
}
  0x27   : > { %s2550_s23 = scalar_lea.vmem %s391_s20, 2304  ;;  %p2558_p8 = scmp.lt.s32.totalorder %s391_s20, %s391_s20 }
  0x28   : > { %p2551_p7 = scmp.ne.s32.totalorder %s391_s20, %s2550_s23  ;;  %p2559_p4 = scmp.lt.s32.totalorder %s2550_s23, %s2550_s23 }
  0x2a   : > { %p2553_p9 = pnand %p2551_p7, %p2539_p1  ;;  %p2560_p11 = por %p2559_p4, %p2558_p8 }
  0x2c   : > { %p2554_p12 = pneg %p2553_p9 }
  0x2e   : > { %p2561_p10 = pnand %p2560_p11, %p2554_p12 }
  0x30   : > { %2564 = shalt.err (!%p2561_p10)
}
  0x31   : > { %s2682_s25 = smov 128   ;;  %s2683_s30 = smov 8  }
  0x32   : > { %2334 = dma.hbm_to_vmem [thread:$0]  (!%p2829_p13), %s3235_s8, 2304, %s391_s20, [#allocation4], %s2682_s25, %s2682_s25, %s2683_s30  }
  0x33   : > { %p3262_p0 = scmp.ne.s32.totalorder %s3259_s17, 0 }
  0x34   : > { %p3263_p2 = scmp.ne.s32.totalorder (!%p3262_p0), %s3260_s18, 0 }
  0x35   : > { %440 = sbr.rel (%p3262_p0) target bundleno = 947 (0x3b3), region = 64 }
  0x3c   : > { %2646 = dma.done.wait (%p3263_p2), [#allocation4], 2304  }
  0x3d   : > { %2648 = vsyncadd (%p3263_p2), [#allocation4], 4294964992  ;;  %p502_p4 = scmp.lt.s32.totalorder %s2671_s24, 1  ;;  %v2684_v0 = vmov 0.0   ;;  %v2685_v1 = vmov 0   ;;  %s3264_s0 = sld [smem:[#allocation16_spill]]  ;;  %v825_v47 = vlaneseq }
  0x3e   : > { %605 = vmatprep.mubr.f32.mxu0 %v2684_v0  ;;  %611 = vmatprep.mubr.f32.mxu1 %v2684_v0  ;;  %v532_v4 = vld [vmem:[%s3229_s2] sm:$0xff]  ;;  %vm534_vm0 = vcmask 64512   ;;  %v533_v5 = vld [vmem:[%s3229_s2 + $0x8] sm:$0xff]  ;;  %vm656_vm1 = vcmask 130048   ;;  %s2687_s20 = smov 17   ;;  %s2688_s28 = smov 15  }
  0x3f   : > { %s2859_s23 = scalar_select %p502_p4, %s2671_s24, 1  ;;  %2407 = vset.pattern.permute.xlu0 %v2685_v1  ;;  %2408 = vset.pattern.permute.xlu1 %v2685_v1  ;;  %v618_v6 = vld [vmem:[%s3230_s3] sm:$0xff]  ;;  %v619_v8 = vld [vmem:[%s3230_s3 + $0x8] sm:$0xff]  ;;  %v826_v49 = vshrl.u32 %v825_v47, 7  ;;  %vm1477_vm2 = vcmask 1039360   ;;  %vm924_vm5 = vcmask 138240  }
  0x40   : > { %v634_v7 = vld [vmem:[%s3231_s4] sm:$0xff]  ;;  %622 = vperm.xlu0 %2407, %v618_v6   ;;  %v635_v9 = vld [vmem:[%s3231_s4 + $0x8] sm:$0xff]  ;;  %s2922_s19 = sand.u32 1, %s2663_s22   ;;  %s2689_s14 = smov 127   ;;  %vm1592_vm10 = vcmask 924672   ;;  %vm1145_vm13 = vcmask 121856  }
  0x41   : > { %s2227_s29 = sshll.u32 %s2859_s23, 4  ;;  %638 = vperm.xlu1 %2408, %v634_v7   ;;  %v805_v10 = vld [vmem:[%s3234_s7] sm:$0x3]  ;;  %s2228_s25 = sshll.u32 %s2859_s23, 5  ;;  %v827_v50 = vsub.s32 0, %v826_v49  ;;  %v839_v51 = vsub.s32 1, %v826_v49 }
  0x42   : > { %s511_s27 = scalar_lea.vmem %s3228_s1, %s2228_s25  ;;  %v655_v17 = vld [vmem:[%s3233_s6] sm:$0x3]  ;;  %s3247_s25 = sshll.u32 %s2922_s19, 5  ;;  %vm1710_vm14 = vcmask 916480   ;;  %vm1260_vm15 = vcmask 7168  }
  0x43   : > { %s506_s18 = scalar_lea.vmem %s3264_s0, %s2227_s29  ;;  %v2892_v11 = vld [vmem:[%s511_s27 + $0x8] sm:$0xff]  ;;  %v2894_v12 = vld [vmem:[%s511_s27 + $0x18] sm:$0xff]  ;;  %v2898_v14 = vld [vmem:[%s511_s27] sm:$0xff]  ;;  %s2931_s30 = scalar_lea.vmem [#allocation6], %s3247_s25 }
  0x44   : > { %v531_v2 = vld [vmem:[%s506_s18 + $0x8] sm:$0xff]  ;;  %v530_v3 = vld [vmem:[%s506_s18] sm:$0xff]  ;;  %627 = vperm.xlu0 %2407, %v619_v8   ;;  %v2231_v13 = vpack.c.bf16 %v2894_v12, %v2892_v11  ;;  %v2900_v15 = vld [vmem:[%s511_s27 + $0x10] sm:$0xff]  ;;  %s3248_s18 = smov 16   ;;  %s2690_s27 = smov 113  }
  0x45   : > { %541 = vmatprep.subr.mxu0 %v531_v2  ;;  %2287 = vmatprep.subr.mxu1 %v531_v2  ;;  %v2233_v16 = vpack.c.bf16 %v2900_v15, %v2898_v14  ;;  %v654_v36 = vld [vmem:[%s3232_s5] sm:$0x3]  ;;  %s2691_s23 = smov 112   ;;  %s2692_s29 = smov 1  }
  0x46   : > { %542 = vmatpush1.msra.mxu0 %v530_v3  ;;  %2288 = vmatpush1.msra.mxu1 %v530_v3  ;;  %s2693_s16 = smov 111   ;;  %s3250_s25 = sshll.u32 %s2671_s24, 9 }
  0x47   : > { %2171 = vmatmul.mubr.msk.f32.vlgmr.msra.gmra.mrb[0].mxu0 %vm534_vm0, %v532_v4  ;;  %2172 = vmatmul.mubr.msk.f32.vlgmr.msra.gmra.mrb[0].mxu1 %vm534_vm0, %v533_v5  ;;  %vm1818_vm0 = vcmask 908288   ;;  %s3138_s17 = scalar_lea.hbm %s3238_s11, %s3250_s25  ;;  %p3281_p10 = scmp.ne.s32.totalorder %s3256_s13, 0 }
  0x48   : > { %724 = vmatprep.mubr.f32.mxu1 %v2684_v0  ;;  %1436 = vmatprep.mubr.f32.mxu0 %v2684_v0 }
  0x49   : > { %643 = vperm.xlu1 %2408, %v635_v9   ;;  %808 = vperm.xlu0 %2407, %v805_v10  }
  0x4a   : > { %2232 = vmatprep.subr.bf16.mxu1 %v2231_v13  ;;  %v1364_v13 = vld [vmem:[#allocation3 + $0x40] sm:$0xff] }
  0x4b   : > { %2234 = vmatpush1.bf16.msra.mxu1 %v2233_v16  ;;  %v1921_v16 = vld [vmem:[%s3236_s9] sm:$0xff] }
  0x4d   : > { %2410 = vrot.lane.b32.xlu1 %v2684_v0, %s3248_s18 }
  0x4e   : > { %2173 = vmatmul.mubr.msk.f32.vlgmr.msra.gmra.mrb[2].mxu1 %vm656_vm1, %v655_v17  ;;  %v1937_v17 = vld [vmem:[%s3237_s10] sm:$0xff] }
  0x4f   : > { %798 = vmatprep.mubr.f32.mxu1 %v2684_v0 }
  0x51   : > { %2415 = vrot.lane.b32.xlu1 %v2684_v0, %s2687_s20 }
  0x55   : > { %2420 = vrot.lane.b32.xlu1 %v2684_v0, %s2688_s28 }
  0xbf   : > { %v623_v18 = vpop.permute.xlu0 %622 }
  0xc0   : > { %v639_v19 = vpop.permute.xlu1 %638 }
  0xc3   : > { %v628_v20 = vpop.permute.xlu0 %627 }
  0xc8   : > { %v644_v27 = vpop.permute.xlu1 %643  ;;  %v809_v37 = vpop.permute.xlu0 %808 }
 0x11a   : > { %v607_v21 = vpop.f32.mrb[0].mxu0  ;;  %v613_v22 = vpop.f32.mrb[0].mxu1 }
 0x11b   : > { %v630_v23 = vmul.f32 %v623_v18, %v607_v21  ;;  %v632_v24 = vmul.f32 %v628_v20, %v613_v22  ;;  %v609_v25 = vpop.f32.mrb[1].mxu0  ;;  %v615_v26 = vpop.f32.mrb[1].mxu1 }
 0x11c   : > { %v631_v28 = vmul.f32 %v623_v18, %v609_v25  ;;  %v633_v29 = vmul.f32 %v628_v20, %v615_v26  ;;  %v1922_v18 = vld [vmem:[%s3236_s9 + $0x8] sm:$0xff]  ;;  %v2411_v20 = vpop.permute.xlu1 %2410  ;;  %v866_v26 = vand.u32 127, %v825_v47 }
 0x11d   : > { %v646_v30 = vadd.f32 %v639_v19, %v630_v23  ;;  %v648_v31 = vadd.f32 %v644_v27, %v632_v24 }
 0x11e   : > { %v647_v32 = vadd.f32 %v639_v19, %v631_v28  ;;  %v649_v33 = vadd.f32 %v644_v27, %v633_v29  ;;  %v1938_v19 = vld [vmem:[%s3237_s10 + $0x8] sm:$0xff]  ;;  %v867_v29 = vadd.s32 128, %v866_v26 }
 0x11f   : > { %v2237_v35 = vpack.c.bf16 %v648_v31, %v646_v30 }
 0x120   : > { %v2235_v34 = vpack.c.bf16 %v649_v33, %v647_v32  ;;  %v2962_v21 = vpop.permute.xlu1 %2415 }
 0x122   : > { %2236 = vmatprep.subr.bf16.mxu1 %v2235_v34 }
 0x123   : > { %2238 = vmatpush1.bf16.msra.mxu1 %v2237_v35  ;;  %v879_v35 = vand.u32 15, %v867_v29 }
 0x124   : > { %v2964_v22 = vpop.permute.xlu1 %2420 }
 0x125   : > { %vm2977_vm3 = vcmp.lt.s32.totalorder %v879_v35, 15  ;;  %vm3006_vm8 = vcmp.ge.s32.totalorder %v879_v35, 1 }
 0x126   : > { %2174 = vmatmul.mubr.msk.f32.vlgmr.msra.gmra.mrb[2].mxu1 %vm656_vm1, %v654_v36  ;;  %v2413_v36 = vunpack.i.h.bf16 %v2411_v20  ;;  %vm2994_vm6 = vmpackc.low %vm2977_vm3, %vm2977_vm3 }
 0x127   : > { %1033 = vmatprep.mubr.f32.mxu1 %v2684_v0  ;;  %vm3032_vm11 = vmpackc.low %vm3006_vm8, %vm3006_vm8 }
 0x1f9   : > { %v800_v38 = vpop.f32.mrb[2].mxu1 }
 0x1fa   : > { %v811_v39 = vadd.f32 %v809_v37, %v800_v38  ;;  %v802_v40 = vpop.f32.mrb[3].mxu1 }
 0x1fb   : > { %v812_v41 = vadd.f32 %v809_v37, %v802_v40  ;;  %v872_v40 = vand.u32 15, %v866_v26 }
 0x1fc   : > { %v2175_v42 = vmul.f32 -1.442695, %v811_v39 }
 0x1fd   : > { %v2176_v43 = vmul.f32 -1.442695, %v812_v41  ;;  %vm2983_vm4 = vcmp.lt.s32.totalorder %v872_v40, 15  ;;  %vm3013_vm9 = vcmp.ge.s32.totalorder %v872_v40, 1  ;;  %v2422_v40 = vunpack.i.l.bf16 %v2964_v22 }
 0x1fe   : > { %2529 = vpow2.f32 %v2175_v42  ;;  %vm3002_vm7 = vmpackc.low %vm2983_vm4, %vm2983_vm4 }
 0x1ff   : > { %2531 = vpow2.f32 %v2176_v43  ;;  %vm3040_vm12 = vmpackc.low %vm3013_vm9, %vm3013_vm9 }
 0x208   : > { %v2530_v44 = vpop.eup %2529 }
 0x209   : > { %v2532_v45 = vpop.eup %2531  ;;  %v819_v46 = vadd.f32 1.0, %v2530_v44 }
 0x20a   : > { %v820_v48 = vadd.f32 1.0, %v2532_v45 }
 0x20b   : > { %2533 = vrcp.f32 %v819_v46 }
 0x20c   : > { %2535 = vrcp.f32 %v820_v48 }
 0x215   : > { %v2534_v52 = vpop.eup %2533 }
 0x216   : > { %v2536_v53 = vpop.eup %2535  ;;  %v828_v54 = vrot.slane %v2534_v52, %v827_v50  ;;  %v840_v55 = vrot.slane %v2534_v52, %v839_v51 }
 0x217   : > { %v832_v56 = vrot.slane %v2536_v53, %v827_v50  ;;  %v844_v57 = vrot.slane %v2536_v53, %v839_v51 }
 0x218   : > { %v833_v58 = vmul.f32 %v828_v54, %v646_v30  ;;  %v835_v59 = vmul.f32 %v828_v54, %v648_v31  ;;  %v845_v60 = vmul.f32 %v840_v55, %v2898_v14  ;;  %v847_v61 = vmul.f32 %v840_v55, %v2900_v15  ;;  %v1365_v15 = vld [vmem:[#allocation3 + $0x48] sm:$0xff] }
 0x219   : > { %v834_v62 = vmul.f32 %v832_v56, %v647_v32  ;;  %v836_v63 = vmul.f32 %v832_v56, %v649_v33  ;;  %v846_v1 = vmul.f32 %v844_v57, %v2892_v11  ;;  %v848_v2 = vmul.f32 %v844_v57, %v2894_v12 }
 0x21a   : > { %v849_v3 = vadd.f32 %v845_v60, %v833_v58  ;;  %v851_v4 = vadd.f32 %v847_v61, %v835_v59  ;;  %v2412_v31 = vunpack.i.l.bf16 %v2411_v20  ;;  %v1697_v20 = vld [vmem:[#allocation3 + $0x78] sm:$0xff] }
 0x21b   : > { %v850_v5 = vadd.f32 %v846_v1, %v834_v62  ;;  %v852_v6 = vadd.f32 %v848_v2, %v836_v63  ;;  %v940_v63 = vld [vmem:[#allocation3 + $0x10] sm:$0xff]  ;;  %v2417_v2 = vunpack.i.l.bf16 %v2962_v21  ;;  %v1832_v1 = vld [vmem:[#allocation3 + $0x80] sm:$0xff] }
 0x21c   : > { %v2424_v7 = vpack.i.bf16 %v851_v4, %v849_v3  ;;  %853 = vst [vmem:[%s2931_s30] sm:$0xff] %v849_v3  ;;  %855 = vst [vmem:[%s2931_s30 + $0x10] sm:$0xff] %v851_v4  ;;  %v2263_v10 = vpack.c.bf16 %v851_v4, %v849_v3 }
 0x21d   : > { %v2439_v8 = vpack.i.bf16 %v850_v5, %v849_v3  ;;  %v2261_v9 = vpack.c.bf16 %v852_v6, %v850_v5  ;;  %854 = vst [vmem:[%s2931_s30 + $0x8] sm:$0xff] %v850_v5  ;;  %856 = vst [vmem:[%s2931_s30 + $0x18] sm:$0xff] %v852_v6  ;;  %v2444_v11 = vpack.i.bf16 %v852_v6, %v851_v4 }
 0x21e   : > { %2425 = vrot.lane.b32.xlu0 %v2424_v7, %s2689_s14  ;;  %v2449_v12 = vpack.i.bf16 %v2684_v0, %v850_v5  ;;  %v2454_v14 = vpack.i.bf16 %v2684_v0, %v852_v6 }
 0x21f   : > { %2440 = vrot.lane.b32.xlu1 %v2439_v8, %s3248_s18  ;;  %2262 = vmatprep.subr.bf16.mxu0 %v2261_v9 }
 0x220   : > { %2264 = vmatpush1.bf16.msra.mxu0 %v2263_v10 }
 0x222   : > { %2430 = vrot.lane.b32.xlu0 %v2424_v7, %s2690_s27 }
 0x223   : > { %2450 = vrot.lane.b32.xlu1 %v2449_v12, %s2689_s14  ;;  %2197 = vmatmul.mubr.msk.f32.vlgmr.msra.gmra.mrb[2].mxu0 %vm656_vm1, %v1364_v13 }
 0x224   : > { %1442 = vmatprep.mubr.f32.mxu0 %v2684_v0 }
 0x226   : > { %2435 = vrot.lane.b32.xlu0 %v2424_v7, %s2691_s23 }
 0x227   : > { %2460 = vrot.lane.b32.xlu1 %v2439_v8, %s2687_s20  ;;  %2198 = vmatmul.mubr.msk.f32.gmra.mrb[4].mxu0 %vm656_vm1, %v1365_v15 }
 0x228   : > { %1563 = vmatprep.mubr.f32.mxu0 %v2684_v0 }
 0x22a   : > { %2445 = vrot.lane.b32.xlu0 %v2444_v11, %s3248_s18  ;;  %s1976_s18 = sshll.u32 %s2931_s30, 4  ;;  %s3130_s18 = int_to_ptr.vmem [resolvable:$true] %s1976_s18 }
 0x22b   : > { %2470 = vrot.lane.b32.xlu1 %v2449_v12, %s2690_s27 }
 0x22e   : > { %2455 = vrot.lane.b32.xlu0 %v2454_v14, %s2689_s14  ;;  %s1958_s14 = scalar_lea.sflag [#allocation5], %s2922_s19 }
 0x22f   : > { %2480 = vrot.lane.b32.xlu1 %v2439_v8, %s2688_s28 }
 0x232   : > { %2465 = vrot.lane.b32.xlu0 %v2444_v11, %s2687_s20  ;;  %s2565_s20 = scalar_lea.vmem %s3130_s18, 512 }
 0x233   : > { %2490 = vrot.lane.b32.xlu1 %v2449_v12, %s2691_s23  ;;  %p2566_p8 = scmp.ne.s32.totalorder %s3130_s18, %s2565_s20 }
 0x235   : > { %p2567_p11 = pnand %p2566_p8, %p3281_p10 }
 0x236   : > { %2475 = vrot.lane.b32.xlu0 %v2454_v14, %s2690_s27 }
 0x237   : > { %2500 = vrot.lane.b32.xlu1 %v2439_v8, %s2692_s29  ;;  %v2418_v8 = vunpack.i.h.bf16 %v2962_v21  ;;  %p2568_p13 = pneg %p2567_p11 }
 0x23a   : > { %2485 = vrot.lane.b32.xlu0 %v2444_v11, %s2688_s28  ;;  %s2694_s28 = smov [#allocation6]  }
 0x23b   : > { %2510 = vrot.lane.b32.xlu1 %v2449_v12, %s2693_s16  ;;  %s2569_s30 = sshll.u32 %s2694_s28, 4  ;;  %s2570_s30 = int_to_ptr.vmem [resolvable:$false] %s2569_s30 }
 0x23c   : > { %s2571_s27 = scalar_lea.vmem %s2570_s30, 1024  ;;  %p2572_p1 = scmp.lt.s32.totalorder %s3130_s18, %s2570_s30 }
 0x23d   : > { %p2573_p3 = scmp.lt.s32.totalorder %s2571_s27, %s2565_s20 }
 0x23e   : > { %2495 = vrot.lane.b32.xlu0 %v2454_v14, %s2691_s23 }
 0x23f   : > { %2515 = vrot.lane.b32.xlu1 %v2684_v0, %s2692_s29  ;;  %p2574_p5 = por %p2573_p3, %p2572_p1 }
 0x241   : > { %p2575_p6 = pnand %p2574_p5, %p2568_p13 }
 0x242   : > { %2505 = vrot.lane.b32.xlu0 %v2444_v11, %s2692_s29 }
 0x243   : > { %1925 = vperm.xlu1 %2408, %v1921_v16  }
 0x246   : > { %2520 = vrot.lane.b32.xlu0 %v2454_v14, %s2693_s16 }
 0x247   : > { %1941 = vperm.xlu1 %2408, %v1937_v17  }
 0x24a   : > { %2525 = vrot.lane.b32.xlu0 %v2424_v7, %s2693_s16 }
 0x24e   : > { %1930 = vperm.xlu0 %2407, %v1922_v18  }
 0x252   : > { %1946 = vperm.xlu0 %2407, %v1938_v19   ;;  %v941_v19 = vld [vmem:[#allocation3 + $0x18] sm:$0xff] }
 0x290   : > { %v2426_v23 = vpop.permute.xlu0 %2425 }
 0x291   : > { %v2441_v24 = vpop.permute.xlu1 %2440  ;;  %v2427_v47 = vunpack.i.l.bf16 %v2426_v23  ;;  %v2428_v52 = vunpack.i.h.bf16 %v2426_v23 }
 0x292   : > { %v2442_v32 = vunpack.i.l.bf16 %v2441_v24  ;;  %v2443_v33 = vunpack.i.h.bf16 %v2441_v24 }
 0x294   : > { %v2966_v25 = vpop.permute.xlu0 %2430  ;;  %v955_v41 = vsel %vm656_vm1, %v2412_v31, %v2442_v32  ;;  %v956_v45 = vsel %vm656_vm1, %v2442_v32, %v2443_v33  ;;  %v1491_v33 = vld [vmem:[#allocation3 + $0x50] sm:$0xff] }
 0x295   : > { %v2451_v27 = vpop.permute.xlu1 %2450  ;;  %v2432_v21 = vunpack.i.l.bf16 %v2966_v25  ;;  %v2433_v29 = vunpack.i.h.bf16 %v2966_v25 }
 0x296   : > { %v2452_v42 = vunpack.i.l.bf16 %v2451_v27  ;;  %v2453_v43 = vunpack.i.h.bf16 %v2451_v27 }
 0x298   : > { %v2969_v28 = vpop.permute.xlu0 %2435  ;;  %v1478_v57 = vsel %vm1477_vm2, %v2427_v47, %v2452_v42  ;;  %v1479_v59 = vsel %vm1477_vm2, %v2452_v42, %v2453_v43 }
 0x299   : > { %v2461_v30 = vpop.permute.xlu1 %2460 }
 0x29a   : > { %v2462_v58 = vunpack.i.l.bf16 %v2461_v30  ;;  %v2463_v60 = vunpack.i.h.bf16 %v2461_v30 }
 0x29c   : > { %v2446_v34 = vpop.permute.xlu0 %2445  ;;  %v925_v13 = vsel %vm924_vm5, %v2417_v2, %v2462_v58  ;;  %v926_v15 = vsel %vm924_vm5, %v2462_v58, %v2463_v60 }
 0x29d   : > { %v2448_v37 = vunpack.i.h.bf16 %v2446_v34  ;;  %v2447_v38 = vunpack.i.l.bf16 %v2446_v34  ;;  %v2971_v39 = vpop.permute.xlu1 %2470 }
 0x29e   : > { %v2472_v14 = vunpack.i.l.bf16 %v2971_v39  ;;  %v2473_v16 = vunpack.i.h.bf16 %v2971_v39  ;;  %v937_v39 = vld [vmem:[#allocation3] sm:$0xff] }
 0x29f   : > { %v957_v44 = vsel %vm656_vm1, %v2413_v36, %v2447_v38  ;;  %v958_v46 = vsel %vm656_vm1, %v2447_v38, %v2448_v37 }
 0x2a0   : > { %v2241_v48 = vpack.c.bf16 %v957_v44, %v955_v41  ;;  %v2456_v49 = vpop.permute.xlu0 %2455  ;;  %v2239_v50 = vpack.c.bf16 %v958_v46, %v956_v45  ;;  %v1593_v34 = vsel %vm1592_vm10, %v2432_v21, %v2472_v14  ;;  %v1594_v36 = vsel %vm1592_vm10, %v2472_v14, %v2473_v16  ;;  %v1607_v16 = vld [vmem:[#allocation3 + $0x68] sm:$0xff] }
 0x2a1   : > { %v2458_v53 = vunpack.i.h.bf16 %v2456_v49  ;;  %v2457_v54 = vunpack.i.l.bf16 %v2456_v49  ;;  %v2981_v55 = vpop.permute.xlu1 %2480  ;;  %v2423_v44 = vunpack.i.h.bf16 %v2964_v22 }
 0x2a2   : > { %2240 = vmatprep.subr.bf16.mxu1 %v2239_v50  ;;  %v2482_v35 = vunpack.i.l.bf16 %v2981_v55  ;;  %v2483_v37 = vunpack.i.h.bf16 %v2981_v55  ;;  %v2437_v55 = vunpack.i.l.bf16 %v2969_v28 }
 0x2a3   : > { %v1480_v61 = vsel %vm1477_vm2, %v2428_v52, %v2457_v54  ;;  %v1481_v62 = vsel %vm1477_vm2, %v2457_v54, %v2458_v53  ;;  %2242 = vmatpush1.bf16.msra.mxu1 %v2241_v48  ;;  %v1492_v48 = vld [vmem:[#allocation3 + $0x58] sm:$0xff]  ;;  %v938_v54 = vld [vmem:[#allocation3 + $0x8] sm:$0xff] }
 0x2a4   : > { %v2265_v3 = vpack.c.bf16 %v1481_v62, %v1479_v59  ;;  %v2268_v4 = vpack.c.bf16 %v1480_v61, %v1478_v57  ;;  %v2466_v5 = vpop.permute.xlu0 %2465  ;;  %v1146_v49 = vsel %vm1145_vm13, %v2422_v40, %v2482_v35  ;;  %v1147_v22 = vsel %vm1145_vm13, %v2482_v35, %v2483_v37  ;;  %v1274_v37 = vld [vmem:[#allocation3 + $0x30] sm:$0xff] }
 0x2a5   : > { %v2468_v9 = vunpack.i.h.bf16 %v2466_v5  ;;  %v2467_v10 = vunpack.i.l.bf16 %v2466_v5  ;;  %v3011_v11 = vpop.permute.xlu1 %2490  ;;  %v2438_v59 = vunpack.i.h.bf16 %v2969_v28 }
 0x2a6   : > { %2177 = vmatmul.mubr.msk.f32.vlgmr.msra.gmra.mrb[4].mxu1 %vm656_vm1, %v940_v63  ;;  %2267 = vmatprep.subr.msk.bf16.mxu0 %vm2994_vm6, %v2265_v3  ;;  %v2493_v50 = vunpack.i.h.bf16 %v3011_v11  ;;  %v2492_v51 = vunpack.i.l.bf16 %v3011_v11  ;;  %v1606_v63 = vld [vmem:[#allocation3 + $0x60] sm:$0xff] }
 0x2a7   : > { %v927_v17 = vsel %vm924_vm5, %v2418_v8, %v2467_v10  ;;  %v928_v18 = vsel %vm924_vm5, %v2467_v10, %v2468_v9  ;;  %2270 = vmatpush1.bf16.msk.msra.mxu0 %vm3002_vm7, %v2268_v4  ;;  %1039 = vmatprep.mubr.f32.mxu1 %v2684_v0  ;;  %v1159_v9 = vld [vmem:[#allocation3 + $0x20] sm:$0xff] }
 0x2a8   : > { %v2243_v23 = vpack.c.bf16 %v928_v18, %v926_v15  ;;  %v2246_v24 = vpack.c.bf16 %v927_v17, %v925_v13  ;;  %v2476_v26 = vpop.permute.xlu0 %2475  ;;  %v1711_v2 = vsel %vm1710_vm14, %v2437_v55, %v2492_v51  ;;  %v1712_v28 = vsel %vm1710_vm14, %v2492_v51, %v2493_v50 }
 0x2a9   : > { %v2478_v30 = vunpack.i.h.bf16 %v2476_v26  ;;  %v2477_v31 = vunpack.i.l.bf16 %v2476_v26  ;;  %v3045_v32 = vpop.permute.xlu1 %2500  ;;  %v1160_v26 = vld [vmem:[#allocation3 + $0x28] sm:$0xff] }
 0x2aa   : > { %2178 = vmatmul.mubr.msk.f32.gmra.mrb[6].mxu1 %vm656_vm1, %v941_v19  ;;  %2245 = vmatprep.subr.msk.bf16.mxu1 %vm3032_vm11, %v2243_v23  ;;  %v2503_v3 = vunpack.i.h.bf16 %v3045_v32  ;;  %v2502_v4 = vunpack.i.l.bf16 %v3045_v32 }
 0x2ab   : > { %v1595_v25 = vsel %vm1592_vm10, %v2433_v29, %v2477_v31  ;;  %v1596_v38 = vsel %vm1592_vm10, %v2477_v31, %v2478_v30  ;;  %2248 = vmatpush1.bf16.msk.msra.mxu1 %vm3040_vm12, %v2246_v24  ;;  %1116 = vmatprep.mubr.f32.mxu1 %v2684_v0 }
 0x2ac   : > { %v2271_v41 = vpack.c.bf16 %v1596_v38, %v1594_v36  ;;  %v2274_v42 = vpack.c.bf16 %v1595_v25, %v1593_v34  ;;  %v2486_v43 = vpop.permute.xlu0 %2485  ;;  %2203 = vmatmul.mubr.msk.f32.vlgmr.msra.gmra.mrb[2].mxu0 %vm656_vm1, %v1491_v33  ;;  %v1262_v17 = vsel %vm1260_vm15, %v2502_v4, %v2503_v3  ;;  %v1696_v34 = vld [vmem:[#allocation3 + $0x70] sm:$0xff] }
 0x2ad   : > { %v2488_v45 = vunpack.i.h.bf16 %v2486_v43  ;;  %v2487_v46 = vunpack.i.l.bf16 %v2486_v43  ;;  %v3062_v47 = vpop.permute.xlu1 %2510  ;;  %1569 = vmatprep.mubr.f32.mxu0 %v2684_v0 }
 0x2ae   : > { %2183 = vmatmul.mubr.msk.f32.vlgmr.msra.gmra.mrb[4].mxu1 %vm656_vm1, %v937_v39  ;;  %2273 = vmatprep.subr.msk.bf16.mxu0 %vm3032_vm11, %v2271_v41  ;;  %v2513_v18 = vunpack.i.h.bf16 %v3062_v47  ;;  %v2512_v19 = vunpack.i.l.bf16 %v3062_v47 }
 0x2af   : > { %v1148_v52 = vsel %vm1145_vm13, %v2423_v44, %v2487_v46  ;;  %v1149_v53 = vsel %vm1145_vm13, %v2487_v46, %v2488_v45  ;;  %2276 = vmatpush1.bf16.msk.msra.mxu0 %vm3040_vm12, %v2274_v42  ;;  %1122 = vmatprep.mubr.f32.mxu1 %v2684_v0  ;;  %v1275_v42 = vld [vmem:[#allocation3 + $0x38] sm:$0xff]  ;;  %v1833_v44 = vld [vmem:[#allocation3 + $0x88] sm:$0xff] }
 0x2b0   : > { %v2249_v56 = vpack.c.bf16 %v1149_v53, %v1147_v22  ;;  %v2252_v57 = vpack.c.bf16 %v1148_v52, %v1146_v49  ;;  %v2496_v58 = vpop.permute.xlu0 %2495  ;;  %2204 = vmatmul.mubr.msk.f32.gmra.mrb[4].mxu0 %vm656_vm1, %v1492_v48  ;;  %v1820_v35 = vsel %vm1818_vm0, %v2512_v19, %v2513_v18 }
 0x2b1   : > { %v2498_v60 = vunpack.i.h.bf16 %v2496_v58  ;;  %v2497_v61 = vunpack.i.l.bf16 %v2496_v58  ;;  %v2516_v62 = vpop.permute.xlu1 %2515  ;;  %1678 = vmatprep.mubr.f32.mxu0 %v2684_v0 }
 0x2b2   : > { %2184 = vmatmul.mubr.msk.f32.gmra.mrb[6].mxu1 %vm656_vm1, %v938_v54  ;;  %2251 = vmatprep.subr.msk.bf16.mxu1 %vm2994_vm6, %v2249_v56  ;;  %v2518_v7 = vunpack.i.h.bf16 %v2516_v62  ;;  %v2517_v8 = vunpack.i.l.bf16 %v2516_v62 }
 0x2b3   : > { %v1713_v5 = vsel %vm1710_vm14, %v2438_v59, %v2497_v61  ;;  %2254 = vmatpush1.bf16.msk.msra.mxu1 %vm3002_vm7, %v2252_v57  ;;  %1231 = vmatprep.mubr.f32.mxu1 %v2684_v0  ;;  %v1714_v10 = vsel %vm1710_vm14, %v2497_v61, %v2498_v60 }
 0x2b4   : > { %v2279_v11 = vpack.c.bf16 %v1713_v5, %v1711_v2  ;;  %v2506_v12 = vpop.permute.xlu0 %2505  ;;  %2209 = vmatmul.mubr.msk.f32.vlgmr.msra.gmra.mrb[2].mxu0 %vm656_vm1, %v1606_v63  ;;  %v2277_v13 = vpack.c.bf16 %v1714_v10, %v1712_v28  ;;  %v1261_v21 = vsel %vm1260_vm15, %v2517_v8, %v2502_v4 }
 0x2b5   : > { %v2508_v14 = vunpack.i.h.bf16 %v2506_v12  ;;  %v2507_v15 = vunpack.i.l.bf16 %v2506_v12  ;;  %1684 = vmatprep.mubr.f32.mxu0 %v2684_v0 }
 0x2b6   : > { %2189 = vmatmul.mubr.msk.f32.vlgmr.msra.gmra.mrb[4].mxu1 %vm656_vm1, %v1159_v9  ;;  %2278 = vmatprep.subr.bf16.mxu0 %v2277_v13 }
 0x2b7   : > { %v1263_v23 = vsel %vm1260_vm15, %v2518_v7, %v2507_v15  ;;  %v1264_v24 = vsel %vm1260_vm15, %v2507_v15, %v2508_v14  ;;  %2280 = vmatpush1.bf16.msra.mxu0 %v2279_v11  ;;  %1237 = vmatprep.mubr.f32.mxu1 %v2684_v0 }
 0x2b8   : > { %v2255_v29 = vpack.c.bf16 %v1264_v24, %v1262_v17  ;;  %v2258_v30 = vpack.c.bf16 %v1263_v23, %v1261_v21  ;;  %v2521_v31 = vpop.permute.xlu0 %2520  ;;  %2210 = vmatmul.mubr.msk.f32.gmra.mrb[4].mxu0 %vm656_vm1, %v1607_v16 }
 0x2b9   : > { %v2523_v32 = vunpack.i.h.bf16 %v2521_v31  ;;  %v2522_v33 = vunpack.i.l.bf16 %v2521_v31  ;;  %1789 = vmatprep.mubr.f32.mxu0 %v2684_v0 }
 0x2ba   : > { %2190 = vmatmul.mubr.msk.f32.gmra.mrb[6].mxu1 %vm656_vm1, %v1160_v26  ;;  %2257 = vmatprep.subr.msk.bf16.mxu1 %vm3032_vm11, %v2255_v29 }
 0x2bb   : > { %v1822_v36 = vsel %vm1818_vm0, %v2522_v33, %v2523_v32  ;;  %2260 = vmatpush1.bf16.msk.msra.mxu1 %vm3040_vm12, %v2258_v30  ;;  %1346 = vmatprep.mubr.f32.mxu1 %v2684_v0 }
 0x2bc   : > { %v2281_v25 = vpack.c.bf16 %v1822_v36, %v1820_v35  ;;  %v2526_v38 = vpop.permute.xlu0 %2525  ;;  %2211 = vmatmul.mubr.msk.f32.vlgmr.msra.gmra.mrb[2].mxu0 %vm656_vm1, %v1696_v34 }
 0x2bd   : > { %v2528_v39 = vunpack.i.h.bf16 %v2526_v38  ;;  %v2527_v40 = vunpack.i.l.bf16 %v2526_v38  ;;  %1795 = vmatprep.mubr.f32.mxu0 %v2684_v0 }
 0x2be   : > { %2195 = vmatmul.mubr.msk.f32.vlgmr.msra.gmra.mrb[4].mxu1 %vm656_vm1, %v1274_v37  ;;  %2283 = vmatprep.subr.msk.bf16.mxu0 %vm2994_vm6, %v2281_v25 }
 0x2bf   : > { %v1819_v27 = vsel %vm1818_vm0, %v2527_v40, %v2512_v19  ;;  %v1821_v41 = vsel %vm1818_vm0, %v2528_v39, %v2522_v33  ;;  %1352 = vmatprep.mubr.f32.mxu1 %v2684_v0 }
 0x2c0   : > { %v2284_v43 = vpack.c.bf16 %v1821_v41, %v1819_v27  ;;  %2212 = vmatmul.mubr.msk.f32.gmra.mrb[4].mxu0 %vm656_vm1, %v1697_v20 }
 0x2c1   : > { %1904 = vmatprep.mubr.f32.mxu0 %v2684_v0 }
 0x2c2   : > { %2196 = vmatmul.mubr.msk.f32.gmra.mrb[6].mxu1 %vm656_vm1, %v1275_v42  ;;  %2286 = vmatpush1.bf16.msk.msra.mxu0 %vm3002_vm7, %v2284_v43 }
 0x2c5   : > { %2217 = vmatmul.mubr.msk.f32.vlgmr.msra.gmra.mrb[2].mxu0 %vm656_vm1, %v1832_v1 }
 0x2c6   : > { %1910 = vmatprep.mubr.f32.mxu0 %v2684_v0 }
 0x2c9   : > { %2218 = vmatmul.mubr.msk.f32.gmra.mrb[4].mxu0 %vm656_vm1, %v1833_v44 }
 0x2ca   : > { %2578 = shalt.err (!%p2575_p6)
}
 0x2cb   : > { %s2579_s23 = scalar_lea.hbm %s3138_s17, 512  ;;  %s2583_s28 = scalar_lea.hbm %s3238_s11, 1024 }
 0x2cc   : > { %p2580_p7 = scmp.ne.s32.totalorder %s3138_s17, %s2579_s23  ;;  %p2584_p0 = scmp.lt.u32.totalorder %s3138_s17, %s3238_s11 }
 0x2cd   : > { %p2585_p2 = scmp.lt.u32.totalorder %s2583_s28, %s2579_s23  ;;  %p2587_p8 = scmp.lt.u32.totalorder %s2579_s23, %s3138_s17 }
 0x2ce   : > { %p2581_p9 = pnand %p2580_p7, %p3281_p10 }
 0x2cf   : > { %p2586_p4 = por %p2585_p2, %p2584_p0 }
 0x2d0   : > { %p2582_p12 = pneg %p2581_p9 }
 0x2d1   : > { %p2588_p11 = por %p2587_p8, %p2586_p4 }
 0x2d3   : > { %p2589_p13 = pnand %p2588_p11, %p2582_p12 }
 0x2d5   : > { %2592 = shalt.err (!%p2589_p13)
}
 0x2d6   : > { %s3251_s20 = smov 256   ;;  %s3282_s27 = smov 16   ;;  %v1926_v46 = vpop.permute.xlu1 %1925  ;;  %v1931_v51 = vpop.permute.xlu0 %1930 }
 0x2d7   : > { %2327 = dma.vmem_to_hbm [thread:$0]  (%p3281_p10), %s3130_s18, 512, %s3138_s17, %s1958_s14, %s3251_s20, %s3251_s20, %s3282_s27  }
 0x2d8   : > { %s3283_s18 = sshll.u32 %s2922_s19, 5  ;;  %s3284_s14 = sshll.u32 %s2671_s24, 9 }
 0x2d9   : > { %s501_s25 = scalar_lea.vmem [#allocation7], %s3283_s18  ;;  %s3176_s16 = scalar_lea.hbm %s3239_s12, %s3284_s14 }
 0x2da   : > { %v1942_v53 = vpop.permute.xlu1 %1941  ;;  %s1995_s17 = sshll.u32 %s501_s25, 4  ;;  %v1947_v62 = vpop.permute.xlu0 %1946  ;;  %s1963_s28 = scalar_lea.sflag [#allocation8], %s2922_s19  ;;  %s3169_s17 = int_to_ptr.vmem [resolvable:$true] %s1995_s17 }
 0x2db   : > { %s2593_s30 = scalar_lea.vmem %s3169_s17, 512  ;;  %s2696_s18 = smov [#allocation7]  }
 0x2dc   : > { %p2594_p1 = scmp.ne.s32.totalorder %s3169_s17, %s2593_s30  ;;  %s2597_s20 = sshll.u32 %s2696_s18, 4  ;;  %s2598_s20 = int_to_ptr.vmem [resolvable:$false] %s2597_s20 }
 0x2dd   : > { %s2599_s0 = scalar_lea.vmem %s2598_s20, 1024  ;;  %p2600_p6 = scmp.lt.s32.totalorder %s3169_s17, %s2598_s20 }
 0x2de   : > { %p2595_p3 = pnand %p2594_p1, %p3281_p10  ;;  %p2601_p7 = scmp.lt.s32.totalorder %s2599_s0, %s2593_s30 }
 0x2e0   : > { %p2596_p5 = pneg %p2595_p3  ;;  %p2602_p9 = por %p2601_p7, %p2600_p6 }
 0x2e2   : > { %p2603_p12 = pnand %p2602_p9, %p2596_p5 }
 0x391   : > { %v1348_v0 = vpop.f32.mrb[4].mxu1 }
 0x392   : > { %v1350_v6 = vpop.f32.mrb[5].mxu1 }
 0x395   : > { %v1354_v45 = vpop.f32.mrb[6].mxu1 }
 0x396   : > { %v1356_v47 = vpop.f32.mrb[7].mxu1 }
 0x398   : > { %v1906_v48 = vpop.f32.mrb[2].mxu0 }
 0x399   : > { %v2289_v49 = vadd.f32 %v1906_v48, %v1348_v0  ;;  %v1908_v50 = vpop.f32.mrb[3].mxu0 }
 0x39a   : > { %v2290_v22 = vadd.f32 %v1908_v50, %v1350_v6 }
 0x39b   : > { %v1933_v52 = vmul.f32 %v2289_v49, %v1926_v46 }
 0x39c   : > { %v1934_v54 = vmul.f32 %v2290_v22, %v1926_v46  ;;  %v1912_v55 = vpop.f32.mrb[4].mxu0 }
 0x39d   : > { %v1949_v56 = vadd.f32 %v1942_v53, %v1933_v52  ;;  %v2291_v57 = vadd.f32 %v1912_v55, %v1354_v45  ;;  %v1914_v58 = vpop.f32.mrb[5].mxu0 }
 0x39e   : > { %v1950_v59 = vadd.f32 %v1942_v53, %v1934_v54  ;;  %v2292_v60 = vadd.f32 %v1914_v58, %v1356_v47 }
 0x39f   : > { %1953 = vst [vmem:[%s501_s25] sm:$0xff] %v1949_v56  ;;  %v1935_v61 = vmul.f32 %v2291_v57, %v1931_v51 }
 0x3a0   : > { %1954 = vst [vmem:[%s501_s25 + $0x8] sm:$0xff] %v1950_v59  ;;  %v1936_v63 = vmul.f32 %v2292_v60, %v1931_v51 }
 0x3a1   : > { %v1951_v2 = vadd.f32 %v1947_v62, %v1935_v61 }
 0x3a2   : > { %v1952_v3 = vadd.f32 %v1947_v62, %v1936_v63 }
 0x3a3   : > { %1955 = vst [vmem:[%s501_s25 + $0x10] sm:$0xff] %v1951_v2 }
 0x3a4   : > { %1956 = vst [vmem:[%s501_s25 + $0x18] sm:$0xff] %v1952_v3 }
 0x3a5   : > { %2606 = shalt.err (!%p2603_p12)
}
 0x3a6   : > { %s2607_s24 = scalar_lea.hbm %s3176_s16, 512  ;;  %s2611_s23 = scalar_lea.hbm %s3239_s12, 1024 }
 0x3a7   : > { %p2608_p0 = scmp.ne.s32.totalorder %s3176_s16, %s2607_s24  ;;  %p2612_p8 = scmp.lt.u32.totalorder %s3176_s16, %s3239_s12 }
 0x3a8   : > { %p2613_p11 = scmp.lt.u32.totalorder %s2611_s23, %s2607_s24  ;;  %p2615_p1 = scmp.lt.u32.totalorder %s2607_s24, %s3176_s16 }
 0x3a9   : > { %p2609_p2 = pnand %p2608_p0, %p3281_p10 }
 0x3aa   : > { %p2614_p13 = por %p2613_p11, %p2612_p8 }
 0x3ab   : > { %p2610_p4 = pneg %p2609_p2 }
 0x3ac   : > { %p2616_p3 = por %p2615_p1, %p2614_p13 }
 0x3ae   : > { %p2617_p5 = pnand %p2616_p3, %p2610_p4 }
 0x3b0   : > { %2620 = shalt.err (!%p2617_p5)
}
 0x3b1   : > { %s3285_s0 = smov 256  }
 0x3b2   : > { %2328 = dma.vmem_to_hbm [thread:$0]  (%p3281_p10), %s3169_s17, 512, %s3176_s16, %s1963_s28, %s3285_s0, %s3285_s0, %s3282_s27  }
 0x3b3 PF: > { %p2344_p6 = scmp.ge.s32.totalorder %s2679_s26, 2  ;;  %s2010_s30 = sand.u32 1, %s2659_s21  }
 0x3b4   : > { %p3286_p7 = scmp.ne.s32.totalorder %s3257_s15, 0  ;;  %s2011_s18 = scalar_lea.sflag [#allocation5], %s2010_s30 }
 0x3b6   : > { %p2336_p9 = pnand %p2344_p6, %p3286_p7 }
 0x3b8   : > { %2650 = dma.done.wait (!%p2336_p9), %s2011_s18, 512  }
 0x3b9   : > { %2652 = vsyncadd (!%p2336_p9), %s2011_s18, 4294966784  ;;  %s2020_s13 = scalar_lea.sflag [#allocation8], %s2010_s30 }
 0x3ba   : > { %2654 = dma.done.wait (!%p2336_p9), %s2020_s13, 512  }
 0x3bb   : > { %2656 = vsyncadd (!%p2336_p9), %s2020_s13, 4294966784  ;;  %s30_s26 = sadd.s32 1, %s2679_s26   ;;  %s3287_s19 = sld [smem:[#allocation12_spill]] }
 0x3bc   : > { %p27_p12 = scmp.ge.s32.totalorder %s30_s26, 4   ;;  %s3288_s23 = sld [smem:[#allocation15_spill]] }
 0x3bd   : > { %s3289_s24 = sld [smem:[#allocation13_spill]]  ;;  %s3290_s25 = sld [smem:[#allocation14_spill]] }
 0x3be   : > { %s3291_s21 = smov %s2663_s22  ;;  %29 = sbr.rel (!%p27_p12) target bundleno = 9 (0x9), region = 143 }
 0x3c1   : > { %s3292_s22 = smov %s3287_s19 }
 0x3c5   :  { %2025 = vsyncpa [#allocation4], 1 }
 0x3c6   :  { %2027 = vsyncpa [#allocation4 + $0x1], 1 }
 0x3c7   :  { %2028 = vsyncpa [#allocation5], 1 }
 0x3c8   :  { %2030 = vsyncpa [#allocation5 + $0x1], 1 }
 0x3c9   :  { %2031 = vsyncpa [#allocation8], 1 }
 0x3ca   :  { %2033 = vsyncpa [#allocation8 + $0x1], 1 }

</bundles_post_ra>
